<compile_context>
chip_gen: v7x
topology: tpu7x:2x2x1
jax: 0.10.0
libtpu: 0.0.40
codegen_flags: <defaults>
</compile_context>

<pallas_src>
import jax
import jax.numpy as jnp
from jax.experimental import pallas as pl
from jax.experimental.pallas import tpu as pltpu

OUT_PAD = 128  # lane-dense output width (real output is 3 columns)


# -----------------------------------------------------------------------------
# Pallas kernel: full HNO forward (inference / eval mode)
# -----------------------------------------------------------------------------
def hno_kernel(
    L_ref,      # [N, N]        bf16  scaled Laplacian (-D^-1/2 A D^-1/2)
    x_ref,      # [N, 3]        f32   node coordinates
    w1_ref,     # [K, 3, H]     bf16  conv1 per-tap weights
    w2_ref,     # [K, H, H] or [K*H, H]  bf16  conv2 weights (per-tap or fused)
    w3_ref,     # same as w2
    w4_ref,     # same as w2
    wr_ref,     # [H, OUT_PAD]  bf16  mlpRep weight^T, zero-padded to 128 lanes
    p_ref,      # [10, H]       f32   packed: b1,s1,t1, b2,s2,t2, b3,s3,t3, b4
    br_ref,     # [1, OUT_PAD]  f32   mlpRep bias, zero-padded to 128 lanes
    out_ref,    # [N, OUT_PAD]  f32
):
    bf16 = jnp.bfloat16
    L = L_ref[...]
    h = x_ref[...]
    P = p_ref[...]

    def cheb_conv(h, wf, bias):
        # wf.ndim == 3 -> per-tap [K, F_in, F_out]  (used when F_out % 128 != 0)
        # wf.ndim == 2 -> fused   [K*F_in, F_out]   (used when pieces are lane-aligned)
        fin = h.shape[1]
        K = wf.shape[0] if wf.ndim == 3 else wf.shape[0] // fin
        # Chebyshev basis; each T_k is cast to bf16 exactly once.
        t_f32 = [h]
        t_bf = [h.astype(bf16)]
        for k in range(1, K):
            t = jnp.dot(L, t_bf[k - 1], preferred_element_type=jnp.float32)
            if k >= 2:
                t = 2.0 * t - t_f32[k - 2]
            t_f32.append(t)
            t_bf.append(t.astype(bf16))

        if wf.ndim == 2:
            tcat = jnp.concatenate(t_bf, axis=1)                       # [N, K*F_in]
            out = jnp.dot(tcat, wf, preferred_element_type=jnp.float32)
        else:
            out = jnp.dot(t_bf[0], wf[0], preferred_element_type=jnp.float32)
            for k in range(1, K):
                out = out + jnp.dot(t_bf[k], wf[k],
                                    preferred_element_type=jnp.float32)
        return out + bias

    def leaky_relu(v, slope=0.01):
        return jnp.where(v > 0, v, slope * v)

    # x = bano1(leaky_relu(conv1(x)))       (BN folded to scale/shift)
    h = cheb_conv(h, w1_ref[...], P[0:1])
    h = leaky_relu(h) * P[1:2] + P[2:3]
    # x = bano2(leaky_relu(conv2(x)))
    h = cheb_conv(h, w2_ref[...], P[3:4])
    h = leaky_relu(h) * P[4:5] + P[5:6]
    # x = bano3(relu(conv3(x)))
    h = cheb_conv(h, w3_ref[...], P[6:7])
    h = jnp.maximum(h, 0.0) * P[7:8] + P[8:9]
    # x = conv4(x)
    h = cheb_conv(h, w4_ref[...], P[9:10])

    # x_rep = F.normalize(x, p=2, dim=1)  -- rsqrt (EUP) instead of sqrt + divide;
    # max(sumsq, 1e-24) == PyTorch's norm clamp at 1e-12.
    sumsq = jnp.sum(h * h, axis=1, keepdims=True)
    h_rep = h * jax.lax.rsqrt(jnp.maximum(sumsq, 1e-24))

    # x_recon = mlpRep(x_rep)  -- lane-dense (N, 128) store; wrapper slices [:, :3].
    out = jnp.dot(h_rep.astype(bf16), wr_ref[...],
                  preferred_element_type=jnp.float32)
    out_ref[...] = out + br_ref[...]


# -----------------------------------------------------------------------------
# Wrapper: fold/pack parameters, single pallas_call (everything VMEM-resident)
# -----------------------------------------------------------------------------
@jax.jit
def hno_forward(L_hat, x, params):
    n = x.shape[0]
    K, _, H = params["w1"].shape
    bf16 = jnp.bfloat16
    eps = 1e-5

    L = L_hat.astype(bf16)

    # Fuse per-tap weights only when the concat pieces are lane-aligned; otherwise the
    # lane-axis concat in-kernel costs relayout while per-tap [N,H]@[H,H] pops are cheap.
    def maybe_fuse(w):
        k_, fin, fout = w.shape
        if fin % 128 == 0 and fout % 128 == 0:
            return w.reshape(k_ * fin, fout).astype(bf16)   # row order == T0|T1|...
        return w.astype(bf16)

    w1 = params["w1"].astype(bf16)          # conv1 stays per-tap (F_in = 3)
    w2 = maybe_fuse(params["w2"])
    w3 = maybe_fuse(params["w3"])
    w4 = maybe_fuse(params["w4"])

    # Lane-dense output: pad mlpRep weight/bias from 3 to OUT_PAD output columns.
    wr = jnp.zeros((H, OUT_PAD), bf16).at[:, :3].set(params["wr"].T.astype(bf16))
    br = jnp.zeros((1, OUT_PAD), jnp.float32).at[:, :3].set(params["br"])

    # Fold eval-mode BatchNorm1d into a per-feature affine (exact in f32).
    def fold_bn(i):
        scale = params[f"g{i}"] * jax.lax.rsqrt(params[f"v{i}"] + eps)
        shift = params[f"be{i}"] - params[f"m{i}"] * scale
        return scale, shift

    s1, t1 = fold_bn(1)
    s2, t2 = fold_bn(2)
    s3, t3 = fold_bn(3)

    # Pack all small per-feature vectors into ONE slab -> a single DMA.
    slab = jnp.concatenate(
        [params["b1"], s1, t1,
         params["b2"], s2, t2,
         params["b3"], s3, t3,
         params["b4"]], axis=0)             # [10, H] f32

    # --- Cost estimate (advisory) ------------------------------------------------
    fl = 2 * (K - 1) * n * n * 3 + 2 * K * n * 3 * H            # conv1
    fl += 3 * (2 * (K - 1) * n * n * H + 2 * K * n * H * H)     # conv2..conv4
    fl += 2 * n * H * OUT_PAD                                    # mlpRep
    bytes_in = (2 * n * n + 4 * n * 3 + 2 * K * 3 * H + 3 * 2 * K * H * H
                + 2 * H * OUT_PAD + 4 * 10 * H + 4 * OUT_PAD)
    bytes_out = 4 * n * OUT_PAD
    cost = pl.CostEstimate(flops=fl, transcendentals=n,
                           bytes_accessed=bytes_in + bytes_out)

    # --- Explicit VMEM budget (v5e default scoped limit is only 16 MiB) -----------
    act_bytes = 8 * (K + 3) * n * max(H, OUT_PAD)               # f32+bf16 activations
    vmem_limit = min(int(1.5 * (bytes_in + bytes_out + act_bytes)) + (8 << 20),
                     64 << 20)

    inputs = (L, x, w1, w2, w3, w4, wr, slab, br)
    vmem = pl.BlockSpec(memory_space=pltpu.MemorySpace.VMEM)
    # TODO(synk): for batched graphs add a leading "parallel" grid axis (one graph per
    # grid point) so both v7x TensorCores are used; for N too large for VMEM, switch
    # to (tm, N) row-block BlockSpecs over L with h resident.
    out = pl.pallas_call(
        hno_kernel,
        out_shape=jax.ShapeDtypeStruct((n, OUT_PAD), jnp.float32),
        in_specs=[vmem] * len(inputs),
        out_specs=vmem,
        compiler_params=pltpu.CompilerParams(vmem_limit_bytes=vmem_limit),
        cost_estimate=cost,
    )(*inputs)
    return out[:, :3]


# -----------------------------------------------------------------------------
# Pure-JAX f32 reference (for tolerance check)
# -----------------------------------------------------------------------------
def hno_reference(L_hat, x, params):
    def cheb(h, w, b):
        K = w.shape[0]
        ts = [h]
        if K > 1:
            ts.append(L_hat @ h)
        for _ in range(2, K):
            ts.append(2.0 * (L_hat @ ts[-1]) - ts[-2])
        out = b
        for k in range(K):
            out = out + ts[k] @ w[k]
        return out

    def bn(h, i):
        scale = params[f"g{i}"] / jnp.sqrt(params[f"v{i}"] + 1e-5)
        return (h - params[f"m{i}"]) * scale + params[f"be{i}"]

    def lrelu(v):
        return jnp.where(v > 0, v, 0.01 * v)

    h = bn(lrelu(cheb(x, params["w1"], params["b1"])), 1)
    h = bn(lrelu(cheb(h, params["w2"], params["b2"])), 2)
    h = bn(jnp.maximum(cheb(h, params["w3"], params["b3"]), 0.0), 3)
    h = cheb(h, params["w4"], params["b4"])
    norm = jnp.sqrt(jnp.sum(h * h, axis=1, keepdims=True))
    h = h / jnp.maximum(norm, 1e-12)
    return h @ params["wr"].T + params["br"]


# -----------------------------------------------------------------------------
# Glue: graph Laplacian + deterministic parameter init
# -----------------------------------------------------------------------------
def scaled_laplacian_dense(edge_index, num_nodes):
    """PyG ChebConv normalization (sym, lambda_max=2): L_hat = -D^-1/2 A D^-1/2."""
    src, dst = edge_index
    A = jnp.zeros((num_nodes, num_nodes), jnp.float32)
    A = A.at[src, dst].set(1.0)
    A = jnp.maximum(A, A.T)                      # undirected, no self loops
    deg = A.sum(axis=1)
    d_inv_sqrt = jnp.where(deg > 0, 1.0 / jnp.sqrt(deg), 0.0)
    return -(d_inv_sqrt[:, None] * A * d_inv_sqrt[None, :])


def init_params(key, hidden_dim, K):
    """Deterministic synthetic parameters matching the module's shapes."""
    keys = jax.random.split(key, 32)
    ki = iter(range(32))

    def glorot(shape):
        fan_in, fan_out = shape[-2], shape[-1]
        lim = (6.0 / (fan_in + fan_out)) ** 0.5
        return jax.random.uniform(keys[next(ki)], shape, jnp.float32, -lim, lim)

    def bn(dim):
        g = 1.0 + 0.1 * jax.random.normal(keys[next(ki)], (1, dim), jnp.float32)
        b = 0.1 * jax.random.normal(keys[next(ki)], (1, dim), jnp.float32)
        m = 0.1 * jax.random.normal(keys[next(ki)], (1, dim), jnp.float32)
        v = jax.random.uniform(keys[next(ki)], (1, dim), jnp.float32, 0.5, 1.5)
        return g, b, m, v

    H = hidden_dim
    p = {}
    p["w1"] = glorot((K, 3, H)); p["b1"] = jnp.zeros((1, H), jnp.float32)
    p["g1"], p["be1"], p["m1"], p["v1"] = bn(H)
    p["w2"] = glorot((K, H, H)); p["b2"] = jnp.zeros((1, H), jnp.float32)
    p["g2"], p["be2"], p["m2"], p["v2"] = bn(H)
    p["w3"] = glorot((K, H, H)); p["b3"] = jnp.zeros((1, H), jnp.float32)
    p["g3"], p["be3"], p["m3"], p["v3"] = bn(H)
    p["w4"] = glorot((K, H, H)); p["b4"] = jnp.zeros((1, H), jnp.float32)
    # mlpRep: Linear(H, 3). PyTorch weight is [3, H]; kernel consumes W^T padded.
    lim = 1.0 / (H ** 0.5)
    p["wr"] = jax.random.uniform(keys[next(ki)], (3, H), jnp.float32, -lim, lim)
    p["br"] = jax.random.uniform(keys[next(ki)], (1, 3), jnp.float32, -lim, lim)
    return p


if __name__ == "__main__":
    N, HIDDEN, K = 64, 32, 3

    key = jax.random.PRNGKey(0)
    k_x, k_p = jax.random.split(key)

    # Node coordinates [N, 3] (protein-like point cloud).
    x = jax.random.normal(k_x, (N, 3), jnp.float32)

    # Deterministic graph: ring + a few chords (both directions, no self loops).
    src = list(range(N)) + [i for i in range(0, N, 4)]
    dst = [(i + 1) % N for i in range(N)] + [(i + 7) % N for i in range(0, N, 4)]
    edge_index = jnp.array([src + dst, dst + src], dtype=jnp.int32)

    L_hat = scaled_laplacian_dense(edge_index, N)
    params = init_params(k_p, HIDDEN, K)

    out = hno_forward(L_hat, x, params)
    jax.block_until_ready(out)

    assert out.shape == (N, 3) and out.dtype == jnp.float32
    assert bool(jnp.all(jnp.isfinite(out)))

    # Tolerance check vs. f32 reference (kernel uses bf16 MXU operands).
    ref = hno_reference(L_hat, x, params)
    assert float(jnp.max(jnp.abs(out - ref))) < 0.1

    print("KERNEL_OK")
</pallas_src>

<mosaic_0001>
module attributes {stable_mosaic.version = 11 : i64} {
  func.func @hno_kernel(%arg0: memref<64x64xbf16, #tpu.memory_space<vmem>>, %arg1: memref<64x3xf32, #tpu.memory_space<vmem>>, %arg2: memref<3x3x32xbf16, #tpu.memory_space<vmem>>, %arg3: memref<3x32x32xbf16, #tpu.memory_space<vmem>>, %arg4: memref<3x32x32xbf16, #tpu.memory_space<vmem>>, %arg5: memref<3x32x32xbf16, #tpu.memory_space<vmem>>, %arg6: memref<32x128xbf16, #tpu.memory_space<vmem>>, %arg7: memref<10x32xf32, #tpu.memory_space<vmem>>, %arg8: memref<1x128xf32, #tpu.memory_space<vmem>>, %arg9: memref<64x128xf32, #tpu.memory_space<vmem>>) attributes {dimension_semantics = [], scalar_prefetch = 0 : i64, scratch_operands = 0 : i64, tpu.core_type = #tpu.core_type<tc>} {
    %c0 = arith.constant 0 : index
    %c0_0 = arith.constant 0 : index
    %0 = vector.load %arg0[%c0, %c0_0] : memref<64x64xbf16, #tpu.memory_space<vmem>>, vector<64x64xbf16>
    %c0_1 = arith.constant 0 : index
    %c0_2 = arith.constant 0 : index
    %1 = vector.load %arg1[%c0_1, %c0_2] : memref<64x3xf32, #tpu.memory_space<vmem>>, vector<64x3xf32>
    %c0_3 = arith.constant 0 : index
    %c0_4 = arith.constant 0 : index
    %2 = vector.load %arg7[%c0_3, %c0_4] : memref<10x32xf32, #tpu.memory_space<vmem>>, vector<10x32xf32>
    %c0_5 = arith.constant 0 : index
    %c0_6 = arith.constant 0 : index
    %c0_7 = arith.constant 0 : index
    %3 = vector.load %arg2[%c0_5, %c0_6, %c0_7] : memref<3x3x32xbf16, #tpu.memory_space<vmem>>, vector<3x3x32xbf16>
    %4 = vector.extract_strided_slice %2 {offsets = [0, 0], sizes = [1, 32], strides = [1, 1]} : vector<10x32xf32> to vector<1x32xf32>
    %5 = arith.truncf %1 : vector<64x3xf32> to vector<64x3xbf16>
    %cst = arith.constant dense<0.000000e+00> : vector<64x3xf32>
    %6 = tpu.matmul %0, %5, %cst {dimension_numbers = #tpu.dot_dimension_numbers<[1], [0], [0], [1], [0, 0, 1, 1], [], []>} : vector<64x64xbf16>, vector<64x3xbf16>, vector<64x3xf32> -> vector<64x3xf32>
    %7 = arith.truncf %6 : vector<64x3xf32> to vector<64x3xbf16>
    %cst_8 = arith.constant dense<0.000000e+00> : vector<64x3xf32>
    %8 = tpu.matmul %0, %7, %cst_8 {dimension_numbers = #tpu.dot_dimension_numbers<[1], [0], [0], [1], [0, 0, 1, 1], [], []>} : vector<64x64xbf16>, vector<64x3xbf16>, vector<64x3xf32> -> vector<64x3xf32>
    %cst_9 = arith.constant 2.000000e+00 : f32
    %9 = vector.broadcast %cst_9 : f32 to vector<64x3xf32>
    %10 = arith.mulf %9, %8 : vector<64x3xf32>
    %11 = arith.subf %10, %1 : vector<64x3xf32>
    %12 = arith.truncf %11 : vector<64x3xf32> to vector<64x3xbf16>
    %13 = vector.extract_strided_slice %3 {offsets = [0, 0, 0], sizes = [1, 3, 32], strides = [1, 1, 1]} : vector<3x3x32xbf16> to vector<1x3x32xbf16>
    %14 = vector.shape_cast %13 : vector<1x3x32xbf16> to vector<3x32xbf16>
    %cst_10 = arith.constant dense<0.000000e+00> : vector<64x32xf32>
    %15 = tpu.matmul %5, %14, %cst_10 {dimension_numbers = #tpu.dot_dimension_numbers<[1], [0], [0], [1], [0, 0, 1, 1], [], []>} : vector<64x3xbf16>, vector<3x32xbf16>, vector<64x32xf32> -> vector<64x32xf32>
    %16 = vector.extract_strided_slice %3 {offsets = [1, 0, 0], sizes = [1, 3, 32], strides = [1, 1, 1]} : vector<3x3x32xbf16> to vector<1x3x32xbf16>
    %17 = vector.shape_cast %16 : vector<1x3x32xbf16> to vector<3x32xbf16>
    %cst_11 = arith.constant dense<0.000000e+00> : vector<64x32xf32>
    %18 = tpu.matmul %7, %17, %cst_11 {dimension_numbers = #tpu.dot_dimension_numbers<[1], [0], [0], [1], [0, 0, 1, 1], [], []>} : vector<64x3xbf16>, vector<3x32xbf16>, vector<64x32xf32> -> vector<64x32xf32>
    %19 = arith.addf %15, %18 : vector<64x32xf32>
    %20 = vector.extract_strided_slice %3 {offsets = [2, 0, 0], sizes = [1, 3, 32], strides = [1, 1, 1]} : vector<3x3x32xbf16> to vector<1x3x32xbf16>
    %21 = vector.shape_cast %20 : vector<1x3x32xbf16> to vector<3x32xbf16>
    %cst_12 = arith.constant dense<0.000000e+00> : vector<64x32xf32>
    %22 = tpu.matmul %12, %21, %cst_12 {dimension_numbers = #tpu.dot_dimension_numbers<[1], [0], [0], [1], [0, 0, 1, 1], [], []>} : vector<64x3xbf16>, vector<3x32xbf16>, vector<64x32xf32> -> vector<64x32xf32>
    %23 = arith.addf %19, %22 : vector<64x32xf32>
    %24 = vector.broadcast %4 : vector<1x32xf32> to vector<64x32xf32>
    %25 = arith.addf %23, %24 : vector<64x32xf32>
    %cst_13 = arith.constant 0.000000e+00 : f32
    %26 = vector.broadcast %cst_13 : f32 to vector<64x32xf32>
    %27 = arith.cmpf ogt, %25, %26 : vector<64x32xf32>
    %cst_14 = arith.constant 0.00999999977 : f32
    %28 = vector.broadcast %cst_14 : f32 to vector<64x32xf32>
    %29 = arith.mulf %28, %25 : vector<64x32xf32>
    %30 = arith.select %27, %25, %29 : vector<64x32xi1>, vector<64x32xf32>
    %31 = vector.extract_strided_slice %2 {offsets = [1, 0], sizes = [1, 32], strides = [1, 1]} : vector<10x32xf32> to vector<1x32xf32>
    %32 = vector.broadcast %31 : vector<1x32xf32> to vector<64x32xf32>
    %33 = arith.mulf %30, %32 : vector<64x32xf32>
    %34 = vector.extract_strided_slice %2 {offsets = [2, 0], sizes = [1, 32], strides = [1, 1]} : vector<10x32xf32> to vector<1x32xf32>
    %35 = vector.broadcast %34 : vector<1x32xf32> to vector<64x32xf32>
    %36 = arith.addf %33, %35 : vector<64x32xf32>
    %c0_15 = arith.constant 0 : index
    %c0_16 = arith.constant 0 : index
    %c0_17 = arith.constant 0 : index
    %37 = vector.load %arg3[%c0_15, %c0_16, %c0_17] : memref<3x32x32xbf16, #tpu.memory_space<vmem>>, vector<3x32x32xbf16>
    %38 = vector.extract_strided_slice %2 {offsets = [3, 0], sizes = [1, 32], strides = [1, 1]} : vector<10x32xf32> to vector<1x32xf32>
    %39 = arith.truncf %36 : vector<64x32xf32> to vector<64x32xbf16>
    %cst_18 = arith.constant dense<0.000000e+00> : vector<64x32xf32>
    %40 = tpu.matmul %0, %39, %cst_18 {dimension_numbers = #tpu.dot_dimension_numbers<[1], [0], [0], [1], [0, 0, 1, 1], [], []>} : vector<64x64xbf16>, vector<64x32xbf16>, vector<64x32xf32> -> vector<64x32xf32>
    %41 = arith.truncf %40 : vector<64x32xf32> to vector<64x32xbf16>
    %cst_19 = arith.constant dense<0.000000e+00> : vector<64x32xf32>
    %42 = tpu.matmul %0, %41, %cst_19 {dimension_numbers = #tpu.dot_dimension_numbers<[1], [0], [0], [1], [0, 0, 1, 1], [], []>} : vector<64x64xbf16>, vector<64x32xbf16>, vector<64x32xf32> -> vector<64x32xf32>
    %cst_20 = arith.constant 2.000000e+00 : f32
    %43 = vector.broadcast %cst_20 : f32 to vector<64x32xf32>
    %44 = arith.mulf %43, %42 : vector<64x32xf32>
    %45 = arith.subf %44, %36 : vector<64x32xf32>
    %46 = arith.truncf %45 : vector<64x32xf32> to vector<64x32xbf16>
    %47 = vector.extract_strided_slice %37 {offsets = [0, 0, 0], sizes = [1, 32, 32], strides = [1, 1, 1]} : vector<3x32x32xbf16> to vector<1x32x32xbf16>
    %48 = vector.shape_cast %47 : vector<1x32x32xbf16> to vector<32x32xbf16>
    %cst_21 = arith.constant dense<0.000000e+00> : vector<64x32xf32>
    %49 = tpu.matmul %39, %48, %cst_21 {dimension_numbers = #tpu.dot_dimension_numbers<[1], [0], [0], [1], [0, 0, 1, 1], [], []>} : vector<64x32xbf16>, vector<32x32xbf16>, vector<64x32xf32> -> vector<64x32xf32>
    %50 = vector.extract_strided_slice %37 {offsets = [1, 0, 0], sizes = [1, 32, 32], strides = [1, 1, 1]} : vector<3x32x32xbf16> to vector<1x32x32xbf16>
    %51 = vector.shape_cast %50 : vector<1x32x32xbf16> to vector<32x32xbf16>
    %cst_22 = arith.constant dense<0.000000e+00> : vector<64x32xf32>
    %52 = tpu.matmul %41, %51, %cst_22 {dimension_numbers = #tpu.dot_dimension_numbers<[1], [0], [0], [1], [0, 0, 1, 1], [], []>} : vector<64x32xbf16>, vector<32x32xbf16>, vector<64x32xf32> -> vector<64x32xf32>
    %53 = arith.addf %49, %52 : vector<64x32xf32>
    %54 = vector.extract_strided_slice %37 {offsets = [2, 0, 0], sizes = [1, 32, 32], strides = [1, 1, 1]} : vector<3x32x32xbf16> to vector<1x32x32xbf16>
    %55 = vector.shape_cast %54 : vector<1x32x32xbf16> to vector<32x32xbf16>
    %cst_23 = arith.constant dense<0.000000e+00> : vector<64x32xf32>
    %56 = tpu.matmul %46, %55, %cst_23 {dimension_numbers = #tpu.dot_dimension_numbers<[1], [0], [0], [1], [0, 0, 1, 1], [], []>} : vector<64x32xbf16>, vector<32x32xbf16>, vector<64x32xf32> -> vector<64x32xf32>
    %57 = arith.addf %53, %56 : vector<64x32xf32>
    %58 = vector.broadcast %38 : vector<1x32xf32> to vector<64x32xf32>
    %59 = arith.addf %57, %58 : vector<64x32xf32>
    %cst_24 = arith.constant 0.000000e+00 : f32
    %60 = vector.broadcast %cst_24 : f32 to vector<64x32xf32>
    %61 = arith.cmpf ogt, %59, %60 : vector<64x32xf32>
    %cst_25 = arith.constant 0.00999999977 : f32
    %62 = vector.broadcast %cst_25 : f32 to vector<64x32xf32>
    %63 = arith.mulf %62, %59 : vector<64x32xf32>
    %64 = arith.select %61, %59, %63 : vector<64x32xi1>, vector<64x32xf32>
    %65 = vector.extract_strided_slice %2 {offsets = [4, 0], sizes = [1, 32], strides = [1, 1]} : vector<10x32xf32> to vector<1x32xf32>
    %66 = vector.broadcast %65 : vector<1x32xf32> to vector<64x32xf32>
    %67 = arith.mulf %64, %66 : vector<64x32xf32>
    %68 = vector.extract_strided_slice %2 {offsets = [5, 0], sizes = [1, 32], strides = [1, 1]} : vector<10x32xf32> to vector<1x32xf32>
    %69 = vector.broadcast %68 : vector<1x32xf32> to vector<64x32xf32>
    %70 = arith.addf %67, %69 : vector<64x32xf32>
    %c0_26 = arith.constant 0 : index
    %c0_27 = arith.constant 0 : index
    %c0_28 = arith.constant 0 : index
    %71 = vector.load %arg4[%c0_26, %c0_27, %c0_28] : memref<3x32x32xbf16, #tpu.memory_space<vmem>>, vector<3x32x32xbf16>
    %72 = vector.extract_strided_slice %2 {offsets = [6, 0], sizes = [1, 32], strides = [1, 1]} : vector<10x32xf32> to vector<1x32xf32>
    %73 = arith.truncf %70 : vector<64x32xf32> to vector<64x32xbf16>
    %cst_29 = arith.constant dense<0.000000e+00> : vector<64x32xf32>
    %74 = tpu.matmul %0, %73, %cst_29 {dimension_numbers = #tpu.dot_dimension_numbers<[1], [0], [0], [1], [0, 0, 1, 1], [], []>} : vector<64x64xbf16>, vector<64x32xbf16>, vector<64x32xf32> -> vector<64x32xf32>
    %75 = arith.truncf %74 : vector<64x32xf32> to vector<64x32xbf16>
    %cst_30 = arith.constant dense<0.000000e+00> : vector<64x32xf32>
    %76 = tpu.matmul %0, %75, %cst_30 {dimension_numbers = #tpu.dot_dimension_numbers<[1], [0], [0], [1], [0, 0, 1, 1], [], []>} : vector<64x64xbf16>, vector<64x32xbf16>, vector<64x32xf32> -> vector<64x32xf32>
    %cst_31 = arith.constant 2.000000e+00 : f32
    %77 = vector.broadcast %cst_31 : f32 to vector<64x32xf32>
    %78 = arith.mulf %77, %76 : vector<64x32xf32>
    %79 = arith.subf %78, %70 : vector<64x32xf32>
    %80 = arith.truncf %79 : vector<64x32xf32> to vector<64x32xbf16>
    %81 = vector.extract_strided_slice %71 {offsets = [0, 0, 0], sizes = [1, 32, 32], strides = [1, 1, 1]} : vector<3x32x32xbf16> to vector<1x32x32xbf16>
    %82 = vector.shape_cast %81 : vector<1x32x32xbf16> to vector<32x32xbf16>
    %cst_32 = arith.constant dense<0.000000e+00> : vector<64x32xf32>
    %83 = tpu.matmul %73, %82, %cst_32 {dimension_numbers = #tpu.dot_dimension_numbers<[1], [0], [0], [1], [0, 0, 1, 1], [], []>} : vector<64x32xbf16>, vector<32x32xbf16>, vector<64x32xf32> -> vector<64x32xf32>
    %84 = vector.extract_strided_slice %71 {offsets = [1, 0, 0], sizes = [1, 32, 32], strides = [1, 1, 1]} : vector<3x32x32xbf16> to vector<1x32x32xbf16>
    %85 = vector.shape_cast %84 : vector<1x32x32xbf16> to vector<32x32xbf16>
    %cst_33 = arith.constant dense<0.000000e+00> : vector<64x32xf32>
    %86 = tpu.matmul %75, %85, %cst_33 {dimension_numbers = #tpu.dot_dimension_numbers<[1], [0], [0], [1], [0, 0, 1, 1], [], []>} : vector<64x32xbf16>, vector<32x32xbf16>, vector<64x32xf32> -> vector<64x32xf32>
    %87 = arith.addf %83, %86 : vector<64x32xf32>
    %88 = vector.extract_strided_slice %71 {offsets = [2, 0, 0], sizes = [1, 32, 32], strides = [1, 1, 1]} : vector<3x32x32xbf16> to vector<1x32x32xbf16>
    %89 = vector.shape_cast %88 : vector<1x32x32xbf16> to vector<32x32xbf16>
    %cst_34 = arith.constant dense<0.000000e+00> : vector<64x32xf32>
    %90 = tpu.matmul %80, %89, %cst_34 {dimension_numbers = #tpu.dot_dimension_numbers<[1], [0], [0], [1], [0, 0, 1, 1], [], []>} : vector<64x32xbf16>, vector<32x32xbf16>, vector<64x32xf32> -> vector<64x32xf32>
    %91 = arith.addf %87, %90 : vector<64x32xf32>
    %92 = vector.broadcast %72 : vector<1x32xf32> to vector<64x32xf32>
    %93 = arith.addf %91, %92 : vector<64x32xf32>
    %cst_35 = arith.constant 0.000000e+00 : f32
    %94 = vector.broadcast %cst_35 : f32 to vector<64x32xf32>
    %95 = arith.maximumf %93, %94 : vector<64x32xf32>
    %96 = vector.extract_strided_slice %2 {offsets = [7, 0], sizes = [1, 32], strides = [1, 1]} : vector<10x32xf32> to vector<1x32xf32>
    %97 = vector.broadcast %96 : vector<1x32xf32> to vector<64x32xf32>
    %98 = arith.mulf %95, %97 : vector<64x32xf32>
    %99 = vector.extract_strided_slice %2 {offsets = [8, 0], sizes = [1, 32], strides = [1, 1]} : vector<10x32xf32> to vector<1x32xf32>
    %100 = vector.broadcast %99 : vector<1x32xf32> to vector<64x32xf32>
    %101 = arith.addf %98, %100 : vector<64x32xf32>
    %c0_36 = arith.constant 0 : index
    %c0_37 = arith.constant 0 : index
    %c0_38 = arith.constant 0 : index
    %102 = vector.load %arg5[%c0_36, %c0_37, %c0_38] : memref<3x32x32xbf16, #tpu.memory_space<vmem>>, vector<3x32x32xbf16>
    %103 = vector.extract_strided_slice %2 {offsets = [9, 0], sizes = [1, 32], strides = [1, 1]} : vector<10x32xf32> to vector<1x32xf32>
    %104 = arith.truncf %101 : vector<64x32xf32> to vector<64x32xbf16>
    %cst_39 = arith.constant dense<0.000000e+00> : vector<64x32xf32>
    %105 = tpu.matmul %0, %104, %cst_39 {dimension_numbers = #tpu.dot_dimension_numbers<[1], [0], [0], [1], [0, 0, 1, 1], [], []>} : vector<64x64xbf16>, vector<64x32xbf16>, vector<64x32xf32> -> vector<64x32xf32>
    %106 = arith.truncf %105 : vector<64x32xf32> to vector<64x32xbf16>
    %cst_40 = arith.constant dense<0.000000e+00> : vector<64x32xf32>
    %107 = tpu.matmul %0, %106, %cst_40 {dimension_numbers = #tpu.dot_dimension_numbers<[1], [0], [0], [1], [0, 0, 1, 1], [], []>} : vector<64x64xbf16>, vector<64x32xbf16>, vector<64x32xf32> -> vector<64x32xf32>
    %cst_41 = arith.constant 2.000000e+00 : f32
    %108 = vector.broadcast %cst_41 : f32 to vector<64x32xf32>
    %109 = arith.mulf %108, %107 : vector<64x32xf32>
    %110 = arith.subf %109, %101 : vector<64x32xf32>
    %111 = arith.truncf %110 : vector<64x32xf32> to vector<64x32xbf16>
    %112 = vector.extract_strided_slice %102 {offsets = [0, 0, 0], sizes = [1, 32, 32], strides = [1, 1, 1]} : vector<3x32x32xbf16> to vector<1x32x32xbf16>
    %113 = vector.shape_cast %112 : vector<1x32x32xbf16> to vector<32x32xbf16>
    %cst_42 = arith.constant dense<0.000000e+00> : vector<64x32xf32>
    %114 = tpu.matmul %104, %113, %cst_42 {dimension_numbers = #tpu.dot_dimension_numbers<[1], [0], [0], [1], [0, 0, 1, 1], [], []>} : vector<64x32xbf16>, vector<32x32xbf16>, vector<64x32xf32> -> vector<64x32xf32>
    %115 = vector.extract_strided_slice %102 {offsets = [1, 0, 0], sizes = [1, 32, 32], strides = [1, 1, 1]} : vector<3x32x32xbf16> to vector<1x32x32xbf16>
    %116 = vector.shape_cast %115 : vector<1x32x32xbf16> to vector<32x32xbf16>
    %cst_43 = arith.constant dense<0.000000e+00> : vector<64x32xf32>
    %117 = tpu.matmul %106, %116, %cst_43 {dimension_numbers = #tpu.dot_dimension_numbers<[1], [0], [0], [1], [0, 0, 1, 1], [], []>} : vector<64x32xbf16>, vector<32x32xbf16>, vector<64x32xf32> -> vector<64x32xf32>
    %118 = arith.addf %114, %117 : vector<64x32xf32>
    %119 = vector.extract_strided_slice %102 {offsets = [2, 0, 0], sizes = [1, 32, 32], strides = [1, 1, 1]} : vector<3x32x32xbf16> to vector<1x32x32xbf16>
    %120 = vector.shape_cast %119 : vector<1x32x32xbf16> to vector<32x32xbf16>
    %cst_44 = arith.constant dense<0.000000e+00> : vector<64x32xf32>
    %121 = tpu.matmul %111, %120, %cst_44 {dimension_numbers = #tpu.dot_dimension_numbers<[1], [0], [0], [1], [0, 0, 1, 1], [], []>} : vector<64x32xbf16>, vector<32x32xbf16>, vector<64x32xf32> -> vector<64x32xf32>
    %122 = arith.addf %118, %121 : vector<64x32xf32>
    %123 = vector.broadcast %103 : vector<1x32xf32> to vector<64x32xf32>
    %124 = arith.addf %122, %123 : vector<64x32xf32>
    %125 = arith.mulf %124, %124 : vector<64x32xf32>
    %cst_45 = arith.constant dense<0.000000e+00> : vector<64xf32>
    %126 = vector.multi_reduction <add>, %125, %cst_45 [1] : vector<64x32xf32> to vector<64xf32>
    %127 = vector.shape_cast %126 : vector<64xf32> to vector<64x1xf32>
    %cst_46 = arith.constant 1.000000e-24 : f32
    %128 = vector.broadcast %cst_46 : f32 to vector<64x1xf32>
    %129 = arith.maximumf %127, %128 : vector<64x1xf32>
    %130 = math.rsqrt %129 : vector<64x1xf32>
    %131 = vector.broadcast %130 : vector<64x1xf32> to vector<64x32xf32>
    %132 = arith.mulf %124, %131 : vector<64x32xf32>
    %133 = arith.truncf %132 : vector<64x32xf32> to vector<64x32xbf16>
    %c0_47 = arith.constant 0 : index
    %c0_48 = arith.constant 0 : index
    %134 = vector.load %arg6[%c0_47, %c0_48] : memref<32x128xbf16, #tpu.memory_space<vmem>>, vector<32x128xbf16>
    %cst_49 = arith.constant dense<0.000000e+00> : vector<64x128xf32>
    %135 = tpu.matmul %133, %134, %cst_49 {dimension_numbers = #tpu.dot_dimension_numbers<[1], [0], [0], [1], [0, 0, 1, 1], [], []>} : vector<64x32xbf16>, vector<32x128xbf16>, vector<64x128xf32> -> vector<64x128xf32>
    %c0_50 = arith.constant 0 : index
    %c0_51 = arith.constant 0 : index
    %136 = vector.load %arg8[%c0_50, %c0_51] : memref<1x128xf32, #tpu.memory_space<vmem>>, vector<1x128xf32>
    %137 = vector.broadcast %136 : vector<1x128xf32> to vector<64x128xf32>
    %138 = arith.addf %135, %137 : vector<64x128xf32>
    %c0_52 = arith.constant 0 : index
    %c0_53 = arith.constant 0 : index
    %139 = vector.load %arg9[%c0_52, %c0_53] : memref<64x128xf32, #tpu.memory_space<vmem>>, vector<64x128xf32>
    tpu.vector_store %arg9[%c0_52, %c0_53], %138 {strides = array<i32>} : memref<64x128xf32, #tpu.memory_space<vmem>>, vector<64x128xf32>,
    return
  }
}

</mosaic_0001>

<bundles_post_ra>
// kernel: hno_forward.1
= control target key start
LH: loop header
LB: loop body
LE: loop exit
PB: predicated region body
PF: predicated region fallthrough
CT: control target
= control target key end

     0   :  { %vm78_vm0 = vcmask 523264   ;;  %vm258_vm1 = vcmask 1040384   ;;  %vm259_vm2 = vcmask 1041408   ;;  %v2823_v16 = vmov 65535   ;;  %s3398_s1 = inlined_call_operand.vmem [shape: f32[64,3], index: 1, kind: input, shape index: {}]   ;;  %s3399_s0 = inlined_call_operand.vmem [shape: bf16[64,64], index: 0, kind: input, shape index: {}]   ;;  %s3400_s2 = inlined_call_operand.vmem [shape: bf16[3,3,32], index: 2, kind: input, shape index: {}]   ;;  %s3401_s7 = inlined_call_operand.vmem [shape: f32[10,32], index: 7, kind: input, shape index: {}]   ;;  %s3402_s3 = inlined_call_operand.vmem [shape: bf16[3,32,32], index: 3, kind: input, shape index: {}]   ;;  %s3403_s4 = inlined_call_operand.vmem [shape: bf16[3,32,32], index: 4, kind: input, shape index: {}]   ;;  %s3404_s5 = inlined_call_operand.vmem [shape: bf16[3,32,32], index: 5, kind: input, shape index: {}]   ;;  %s3405_s6 = inlined_call_operand.vmem [shape: bf16[32,128], index: 6, kind: input, shape index: {}]   ;;  %s3406_s8 = inlined_call_operand.vmem [shape: f32[1,128], index: 8, kind: input, shape index: {}]   ;;  %s3407_s9 = inlined_call_operand.vmem [shape: f32[64,128], index: 9, kind: output, shape index: {}]  }
   0x1   :  { %v2877_v0 = vld [vmem:[%s3398_s1] sm:$0xff]  ;;  %v2882_v1 = vld [vmem:[%s3398_s1 + $0x8] sm:$0xff]  ;;  %v2887_v2 = vld [vmem:[%s3398_s1 + $0x10] sm:$0xff]  ;;  %v260_v17 = vsel %vm258_vm1, 4294967295, %v2823_v16  ;;  %vm245_vm3 = vcmask 23552   ;;  %vm740_vm12 = vcmask 261120  }
   0x2   :  { %v2891_v3 = vpack.c.bf16 %v2882_v1, %v2877_v0  ;;  %v2896_v4 = vld [vmem:[%s3398_s1 + $0x18] sm:$0xff]  ;;  %v2905_v6 = vld [vmem:[%s3398_s1 + $0x20] sm:$0xff]  ;;  %v2910_v7 = vld [vmem:[%s3398_s1 + $0x28] sm:$0xff]  ;;  %v261_v19 = vsel %vm259_vm2, %v260_v17, 0 }
   0x3   :  { %v2900_v5 = vpack.c.bf16 %v2896_v4, %v2887_v2  ;;  %v2916_v8 = vld [vmem:[%s3399_s0] sm:$0xff]   ;;  %v2922_v9 = vpack.c.bf16 %v2910_v7, %v2905_v6  ;;  %v2929_v10 = vld [vmem:[%s3398_s1 + $0x30] sm:$0xff]  ;;  %v2934_v11 = vld [vmem:[%s3398_s1 + $0x38] sm:$0xff] }
   0x4   :  { %2430 = vmatprep.subr.bf16.mxu0 %v2891_v3  ;;  %2438 = vmatprep.mubr.msk.bf16.mxu0 %vm78_vm0, %v2916_v8  ;;  %v57_v12 = vpack.c.bf16 %v2934_v11, %v2929_v10  ;;  %v2946_v13 = vld [vmem:[%s3399_s0 + $0x8] sm:$0xff]   ;;  %v2951_v14 = vld [vmem:[%s3399_s0 + $0x10] sm:$0xff]   ;;  %v2960_v15 = vld [vmem:[%s3399_s0 + $0x18] sm:$0xff]  }
   0x5   :  { %2431 = vmatpush3.bf16.msra.mxu0 %v2891_v3  ;;  %2454 = vmatprep.mubr.msk.bf16.mxu1 %vm78_vm0, %v2916_v8  ;;  %v52_v18 = vld [vmem:[%s3400_s2 + $0x2] sm:$0x3]  ;;  %v51_v21 = vld [vmem:[%s3400_s2] sm:$0x3]  ;;  %v53_v22 = vld [vmem:[%s3400_s2 + $0x4] sm:$0x3] }
   0x6   :  { %2432 = vmatprep.subr.bf16.mxu0 %v2900_v5  ;;  %v263_v20 = vand.u32 %v261_v19, %v52_v18  ;;  %v343_v23 = vand.u32 %v261_v19, %v51_v21  ;;  %v423_v24 = vand.u32 %v261_v19, %v53_v22 }
   0x9   :  { %2433 = vmatpush3.bf16.msra.mxu0 %v2900_v5 }
   0xa   :  { %2434 = vmatprep.subr.bf16.mxu0 %v2922_v9 }
   0xd   :  { %2435 = vmatpush3.bf16.msra.mxu0 %v2922_v9 }
   0xe   :  { %2436 = vmatprep.subr.bf16.mxu0 %v57_v12 }
  0x11   :  { %2437 = vmatpush3.bf16.msra.mxu0 %v57_v12 }
  0x12   :  { %2462 = vmatprep.subr.bf16.mxu0 %v263_v20 }
  0x14   :  { %2439 = vmatmul.mubr.msk.bf16.vlgmr.msra.gmra.mrb[0].mxu0 %vm78_vm0, %v2946_v13 }
  0x15   :  { %2442 = vmatprep.mubr.msk.bf16.mxu0 %vm78_vm0, %v2951_v14  ;;  %2463 = vmatpush3.bf16.msra.mxu0 %v263_v20 }
  0x16   :  { %2472 = vmatprep.subr.bf16.mxu0 %v343_v23 }
  0x1c   :  { %2443 = vmatmul.mubr.msk.bf16.gmra.mrb[4].mxu0 %vm78_vm0, %v2960_v15 }
  0xe7   :  { %v2440_v25 = vpop.f32.mrb[0].mxu0 }
  0xe8   :  { %v125_v26 = vpop.f32.mrb[1].mxu0 }
  0xe9   :  { %v2441_v27 = vpop.f32.mrb[2].mxu0 }
  0xea   :  { %v157_v28 = vpack.c.bf16 %v2441_v27, %v2440_v25  ;;  %v128_v29 = vpop.f32.mrb[3].mxu0 }
  0xeb   :  { %v156_v30 = vpack.c.bf16 %v128_v29, %v125_v26 }
  0xed   :  { %2446 = vmatprep.subr.bf16.mxu1 %v156_v30  ;;  %2464 = vmatprep.mubr.msk.bf16.mxu0 %vm245_vm3, %v156_v30 }
  0xee   :  { %2447 = vmatpush3.bf16.msra.mxu1 %v156_v30  ;;  %2465 = vmatmul.mubr.msk.bf16.vlgmr.msra.gmra.mrb[8].mxu0 %vm245_vm3, %v157_v28 }
  0xef   :  { %v2444_v31 = vpop.f32.mrb[4].mxu0  ;;  %2448 = vmatprep.subr.bf16.mxu1 %v157_v28  ;;  %2473 = vmatpush3.bf16.msra.mxu0 %v343_v23 }
  0xf0   :  { %v141_v32 = vpop.f32.mrb[5].mxu0  ;;  %2482 = vmatprep.subr.bf16.mxu0 %v423_v24 }
  0xf1   :  { %v2445_v33 = vpop.f32.mrb[6].mxu0 }
  0xf2   :  { %v159_v34 = vpack.c.bf16 %v2445_v33, %v2444_v31  ;;  %v144_v35 = vpop.f32.mrb[7].mxu0  ;;  %2449 = vmatpush3.bf16.msra.mxu1 %v157_v28 }
  0xf3   :  { %v158_v36 = vpack.c.bf16 %v144_v35, %v141_v32 }
  0xf5   :  { %2450 = vmatprep.subr.bf16.mxu1 %v158_v36  ;;  %2468 = vmatprep.mubr.msk.bf16.mxu0 %vm245_vm3, %v158_v36 }
  0xf6   :  { %2451 = vmatpush3.bf16.msra.mxu1 %v158_v36  ;;  %2469 = vmatmul.mubr.msk.bf16.gmra.mrb[12].mxu0 %vm245_vm3, %v159_v34 }
  0xf7   :  { %2452 = vmatprep.subr.bf16.mxu1 %v159_v34  ;;  %2474 = vmatprep.mubr.msk.bf16.mxu0 %vm245_vm3, %v2891_v3 }
  0xfa   :  { %2453 = vmatpush3.bf16.msra.mxu1 %v159_v34 }
  0xfd   :  { %2455 = vmatmul.mubr.msk.bf16.vlgmr.msra.gmra.mrb[0].mxu1 %vm78_vm0, %v2946_v13 }
  0xfe   :  { %2458 = vmatprep.mubr.msk.bf16.mxu1 %vm78_vm0, %v2951_v14  ;;  %2475 = vmatmul.mubr.msk.bf16.vlgmr.msra.gmra.mrb[8].mxu0 %vm245_vm3, %v2900_v5 }
  0xff   :  { %2483 = vmatpush3.bf16.msra.mxu0 %v423_v24  ;;  %2478 = vmatprep.mubr.msk.bf16.mxu0 %vm245_vm3, %v2922_v9 }
 0x105   :  { %2459 = vmatmul.mubr.msk.bf16.gmra.mrb[4].mxu1 %vm78_vm0, %v2960_v15 }
 0x106   :  { %2479 = vmatmul.mubr.msk.bf16.gmra.mrb[12].mxu0 %vm245_vm3, %v57_v12  ;;  %2500 = vmatprep.mubr.msk.bf16.mxu1 %vm78_vm0, %v2916_v8 }
 0x1d0   :  { %v2456_v37 = vpop.f32.mrb[0].mxu1 }
 0x1d1   :  { %v227_v38 = vmul.f32 2.0, %v2456_v37  ;;  %v194_v39 = vpop.f32.mrb[1].mxu1 }
 0x1d2   :  { %v225_v40 = vmul.f32 2.0, %v194_v39  ;;  %v2457_v41 = vpop.f32.mrb[2].mxu1 }
 0x1d3   :  { %v228_v42 = vmul.f32 2.0, %v2457_v41  ;;  %v197_v43 = vpop.f32.mrb[3].mxu1  ;;  %v235_v45 = vsub.f32 %v227_v38, %v2887_v2 }
 0x1d4   :  { %v226_v44 = vmul.f32 2.0, %v197_v43  ;;  %v233_v47 = vsub.f32 %v225_v40, %v2877_v0 }
 0x1d5   :  { %v236_v46 = vsub.f32 %v228_v42, %v2896_v4  ;;  %v3012_v4 = vld [vmem:[%s3401_s7] sm:$0xff] }
 0x1d6   :  { %v234_v48 = vsub.f32 %v226_v44, %v2882_v1  ;;  %v498_v1 = vlaneseq }
 0x1d7   :  { %v242_v49 = vpack.c.bf16 %v236_v46, %v235_v45 }
 0x1d8   :  { %v241_v50 = vpack.c.bf16 %v234_v48, %v233_v47  ;;  %v2460_v51 = vpop.f32.mrb[4].mxu1  ;;  %v3006_v2 = vshrl.u32 %v498_v1, 7 }
 0x1d9   :  { %v231_v52 = vmul.f32 2.0, %v2460_v51  ;;  %v210_v53 = vpop.f32.mrb[5].mxu1 }
 0x1da   :  { %v229_v54 = vmul.f32 2.0, %v210_v53  ;;  %v2461_v55 = vpop.f32.mrb[6].mxu1  ;;  %2484 = vmatprep.mubr.msk.bf16.mxu0 %vm245_vm3, %v241_v50  ;;  %v500_v3 = vsub.s32 0, %v3006_v2 }
 0x1db   :  { %v232_v56 = vmul.f32 2.0, %v2461_v55  ;;  %v213_v57 = vpop.f32.mrb[7].mxu1  ;;  %2485 = vmatmul.mubr.msk.bf16.vlgmr.msra.gmra.mrb[8].mxu0 %vm245_vm3, %v242_v49  ;;  %v239_v59 = vsub.f32 %v231_v52, %v2929_v10 }
 0x1dc   :  { %v230_v58 = vmul.f32 2.0, %v213_v57  ;;  %v237_v61 = vsub.f32 %v229_v54, %v2905_v6  ;;  %v501_v5 = vrot.slane %v3012_v4, %v500_v3  ;;  %v536_v6 = vsub.s32 1, %v3006_v2 }
 0x1dd   :  { %v240_v60 = vsub.f32 %v232_v56, %v2934_v11  ;;  %v548_v11 = vsub.s32 2, %v3006_v2 }
 0x1de   :  { %v238_v62 = vsub.f32 %v230_v58, %v2910_v7  ;;  %v537_v18 = vrot.slane %v3012_v4, %v536_v6 }
 0x1df   :  { %v244_v63 = vpack.c.bf16 %v240_v60, %v239_v59  ;;  %v549_v24 = vrot.slane %v3012_v4, %v548_v11 }
 0x1e0   :  { %v243_v0 = vpack.c.bf16 %v238_v62, %v237_v61 }
 0x1e2   :  { %2488 = vmatprep.mubr.msk.bf16.mxu0 %vm245_vm3, %v243_v0 }
 0x1e3   :  { %2489 = vmatmul.mubr.msk.bf16.gmra.mrb[12].mxu0 %vm245_vm3, %v244_v63 }
 0x1e4   :  { %2568 = vmatprep.mubr.msk.bf16.mxu0 %vm78_vm0, %v2916_v8 }
 0x2ae   :  { %v2486_v7 = vpop.f32.mrb[8].mxu0 }
 0x2af   :  { %v504_v9 = vadd.f32 %v2486_v7, %v501_v5  ;;  %v459_v10 = vpop.f32.mrb[9].mxu0 }
 0x2b0   :  { %v502_v12 = vadd.f32 %v501_v5, %v459_v10  ;;  %v2487_v16 = vpop.f32.mrb[10].mxu0 }
 0x2b1   :  { %vm512_vm4 = vcmp.gt.f32.partialorder %v504_v9, 0.0  ;;  %v520_v17 = vmul.f32 0.01, %v504_v9  ;;  %v505_v19 = vadd.f32 %v2487_v16, %v501_v5  ;;  %v462_v20 = vpop.f32.mrb[11].mxu0 }
 0x2b2   :  { %vm510_vm5 = vcmp.gt.f32.partialorder %v502_v12, 0.0  ;;  %v518_v21 = vmul.f32 0.01, %v502_v12  ;;  %v503_v22 = vadd.f32 %v501_v5, %v462_v20 }
 0x2b3   :  { %vm513_vm6 = vcmp.gt.f32.partialorder %v505_v19, 0.0  ;;  %v521_v23 = vmul.f32 0.01, %v505_v19  ;;  %v528_v25 = vsel %vm512_vm4, %v504_v9, %v520_v17 }
 0x2b4   :  { %v526_v26 = vsel %vm510_vm5, %v502_v12, %v518_v21  ;;  %vm511_vm7 = vcmp.gt.f32.partialorder %v503_v22, 0.0  ;;  %v519_v27 = vmul.f32 0.01, %v503_v22  ;;  %v540_v33 = vmul.f32 %v537_v18, %v528_v25  ;;  %v2788_v25 = vld [vmem:[%s3402_s3 + $0x8] sm:$0xff]  }
 0x2b5   :  { %v538_v28 = vmul.f32 %v537_v18, %v526_v26  ;;  %v529_v29 = vsel %vm513_vm6, %v505_v19, %v521_v23  ;;  %v2786_v23 = vld [vmem:[%s3402_s3 + $0x18] sm:$0xff]   ;;  %v2789_v26 = vld [vmem:[%s3402_s3 + $0x20] sm:$0xff]  }
 0x2b6   :  { %v541_v30 = vmul.f32 %v537_v18, %v529_v29  ;;  %v527_v31 = vsel %vm511_vm7, %v503_v22, %v519_v27  ;;  %v2490_v32 = vpop.f32.mrb[12].mxu0  ;;  %v3033_v49 = vadd.f32 %v549_v24, %v540_v33  ;;  %v2785_v22 = vld [vmem:[%s3402_s3 + $0x10] sm:$0xff]   ;;  %v2790_v27 = vld [vmem:[%s3402_s3 + $0x28] sm:$0xff]  }
 0x2b7   :  { %v539_v34 = vmul.f32 %v537_v18, %v527_v31  ;;  %v508_v35 = vadd.f32 %v2490_v32, %v501_v5  ;;  %v475_v36 = vpop.f32.mrb[13].mxu0  ;;  %v3023_v39 = vadd.f32 %v549_v24, %v538_v28 }
 0x2b8   :  { %v506_v37 = vadd.f32 %v501_v5, %v475_v36  ;;  %v2491_v38 = vpop.f32.mrb[14].mxu0  ;;  %v3025_v40 = vadd.f32 %v549_v24, %v541_v30 }
 0x2b9   :  { %vm516_vm8 = vcmp.gt.f32.partialorder %v508_v35, 0.0  ;;  %v524_v41 = vmul.f32 0.01, %v508_v35  ;;  %v509_v42 = vadd.f32 %v2491_v38, %v501_v5  ;;  %v478_v43 = vpop.f32.mrb[15].mxu0  ;;  %v3027_v44 = vadd.f32 %v549_v24, %v539_v34 }
 0x2ba   :  { %vm514_vm9 = vcmp.gt.f32.partialorder %v506_v37, 0.0  ;;  %v522_v45 = vmul.f32 0.01, %v506_v37  ;;  %v507_v46 = vadd.f32 %v501_v5, %v478_v43  ;;  %v3038_v55 = vpack.c.bf16 %v3025_v40, %v3033_v49 }
 0x2bb   :  { %vm517_vm10 = vcmp.gt.f32.partialorder %v509_v42, 0.0  ;;  %v525_v47 = vmul.f32 0.01, %v509_v42  ;;  %v3031_v48 = vpack.c.bf16 %v3027_v44, %v3023_v39  ;;  %v532_v50 = vsel %vm516_vm8, %v508_v35, %v524_v41 }
 0x2bc   :  { %v530_v51 = vsel %vm514_vm9, %v506_v37, %v522_v45  ;;  %vm515_vm11 = vcmp.gt.f32.partialorder %v507_v46, 0.0  ;;  %v523_v52 = vmul.f32 0.01, %v507_v46  ;;  %v544_v58 = vmul.f32 %v537_v18, %v532_v50 }
 0x2bd   :  { %v542_v53 = vmul.f32 %v537_v18, %v530_v51  ;;  %v533_v54 = vsel %vm517_vm10, %v509_v42, %v525_v47  ;;  %2492 = vmatprep.subr.bf16.mxu1 %v3031_v48 }
 0x2be   :  { %v545_v56 = vmul.f32 %v537_v18, %v533_v54  ;;  %v531_v57 = vsel %vm515_vm11, %v507_v46, %v523_v52  ;;  %2493 = vmatpush3.bf16.msra.mxu1 %v3031_v48  ;;  %v3051_v0 = vadd.f32 %v549_v24, %v544_v58  ;;  %v1042_v58 = vsub.s32 4, %v3006_v2 }
 0x2bf   :  { %v543_v59 = vmul.f32 %v537_v18, %v531_v57  ;;  %2494 = vmatprep.subr.bf16.mxu1 %v3038_v55  ;;  %v3042_v60 = vadd.f32 %v549_v24, %v542_v53 }
 0x2c0   :  { %v3046_v62 = vadd.f32 %v549_v24, %v545_v56  ;;  %v1006_v56 = vsub.s32 3, %v3006_v2 }
 0x2c1   :  { %v3044_v61 = vadd.f32 %v549_v24, %v543_v59  ;;  %v2787_v24 = vld [vmem:[%s3402_s3] sm:$0xff]  }
 0x2c2   :  { %2495 = vmatpush3.bf16.msra.mxu1 %v3038_v55  ;;  %v573_v1 = vpack.c.bf16 %v3046_v62, %v3051_v0  ;;  %v1007_v57 = vrot.slane %v3012_v4, %v1006_v56 }
 0x2c3   :  { %v572_v63 = vpack.c.bf16 %v3044_v61, %v3042_v60 }
 0x2c5   :  { %2496 = vmatprep.subr.bf16.mxu1 %v572_v63 }
 0x2c6   :  { %2497 = vmatpush3.bf16.msra.mxu1 %v572_v63 }
 0x2c7   :  { %2498 = vmatprep.subr.bf16.mxu1 %v573_v1 }
 0x2ca   :  { %2499 = vmatpush3.bf16.msra.mxu1 %v573_v1 }
 0x2cd   :  { %2501 = vmatmul.mubr.msk.bf16.vlgmr.msra.gmra.mrb[8].mxu1 %vm78_vm0, %v2946_v13 }
 0x2ce   :  { %2504 = vmatprep.mubr.msk.bf16.mxu1 %vm78_vm0, %v2951_v14 }
 0x2d5   :  { %2505 = vmatmul.mubr.msk.bf16.gmra.mrb[12].mxu1 %vm78_vm0, %v2960_v15 }
 0x2d6   :  { %2516 = vmatprep.mubr.msk.bf16.mxu1 %vm78_vm0, %v2916_v8 }
 0x3a0   :  { %v2502_v5 = vpop.f32.mrb[8].mxu1 }
 0x3a1   :  { %v608_v7 = vpop.f32.mrb[9].mxu1 }
 0x3a2   :  { %v2503_v9 = vpop.f32.mrb[10].mxu1 }
 0x3a3   :  { %v640_v10 = vpack.c.bf16 %v2503_v9, %v2502_v5  ;;  %v611_v11 = vpop.f32.mrb[11].mxu1  ;;  %v1043_v5 = vrot.slane %v3012_v4, %v1042_v58 }
 0x3a4   :  { %v639_v12 = vpack.c.bf16 %v611_v11, %v608_v7 }
 0x3a6   :  { %2508 = vmatprep.subr.bf16.mxu1 %v639_v12 }
 0x3a7   :  { %2509 = vmatpush3.bf16.msra.mxu1 %v639_v12 }
 0x3a8   :  { %v2506_v16 = vpop.f32.mrb[12].mxu1  ;;  %2510 = vmatprep.subr.bf16.mxu1 %v640_v10 }
 0x3a9   :  { %v624_v17 = vpop.f32.mrb[13].mxu1 }
 0x3aa   :  { %v2507_v18 = vpop.f32.mrb[14].mxu1 }
 0x3ab   :  { %v642_v19 = vpack.c.bf16 %v2507_v18, %v2506_v16  ;;  %v627_v20 = vpop.f32.mrb[15].mxu1  ;;  %2511 = vmatpush3.bf16.msra.mxu1 %v640_v10 }
 0x3ac   :  { %v641_v21 = vpack.c.bf16 %v627_v20, %v624_v17 }
 0x3ae   :  { %2512 = vmatprep.subr.bf16.mxu1 %v641_v21 }
 0x3af   :  { %2513 = vmatpush3.bf16.msra.mxu1 %v641_v21 }
 0x3b0   :  { %2514 = vmatprep.subr.bf16.mxu1 %v642_v19 }
 0x3b3   :  { %2515 = vmatpush3.bf16.msra.mxu1 %v642_v19 }
 0x3b4   :  { %2524 = vmatprep.subr.bf16.mxu1 %v2785_v22 }
 0x3b6   :  { %2517 = vmatmul.mubr.msk.bf16.vlgmr.msra.gmra.mrb[16].mxu1 %vm78_vm0, %v2946_v13 }
 0x3b7   :  { %2520 = vmatprep.mubr.msk.bf16.mxu1 %vm78_vm0, %v2951_v14  ;;  %2525 = vmatpush3.bf16.msra.mxu1 %v2785_v22 }
 0x3b8   :  { %2526 = vmatprep.subr.bf16.mxu1 %v2786_v23 }
 0x3bb   :  { %2527 = vmatpush3.bf16.msra.mxu1 %v2786_v23 }
 0x3bc   :  { %2536 = vmatprep.subr.bf16.mxu1 %v2787_v24 }
 0x3be   :  { %2521 = vmatmul.mubr.msk.bf16.gmra.mrb[20].mxu1 %vm78_vm0, %v2960_v15 }
 0x3bf   :  { %2528 = vmatprep.mubr.msk.bf16.mxu1 %vm740_vm12, %v639_v12 }
 0x3c6   :  { %2529 = vmatmul.mubr.msk.bf16.vlgmr.msra.gmra.mrb[24].mxu1 %vm740_vm12, %v640_v10 }
 0x3c7   :  { %2532 = vmatprep.mubr.msk.bf16.mxu1 %vm740_vm12, %v641_v21  ;;  %2537 = vmatpush3.bf16.msra.mxu1 %v2787_v24 }
 0x3c8   :  { %2538 = vmatprep.subr.bf16.mxu1 %v2788_v25 }
 0x3cb   :  { %2539 = vmatpush3.bf16.msra.mxu1 %v2788_v25 }
 0x3cc   :  { %2548 = vmatprep.subr.bf16.mxu1 %v2789_v26 }
 0x3ce   :  { %2533 = vmatmul.mubr.msk.bf16.gmra.mrb[28].mxu1 %vm740_vm12, %v642_v19 }
 0x3cf   :  { %2540 = vmatprep.mubr.msk.bf16.mxu1 %vm740_vm12, %v3031_v48 }
 0x3d6   :  { %2541 = vmatmul.mubr.msk.bf16.vlgmr.msra.gmra.mrb[24].mxu1 %vm740_vm12, %v3038_v55 }
 0x3d7   :  { %2544 = vmatprep.mubr.msk.bf16.mxu1 %vm740_vm12, %v572_v63  ;;  %2549 = vmatpush3.bf16.msra.mxu1 %v2789_v26 }
 0x3d8   :  { %2550 = vmatprep.subr.bf16.mxu1 %v2790_v27 }
 0x3db   :  { %2551 = vmatpush3.bf16.msra.mxu1 %v2790_v27 }
 0x3de   :  { %2545 = vmatmul.mubr.msk.bf16.gmra.mrb[28].mxu1 %vm740_vm12, %v573_v1 }
 0x489   :  { %v2518_v28 = vpop.f32.mrb[16].mxu1 }
 0x48a   :  { %v710_v29 = vmul.f32 2.0, %v2518_v28  ;;  %v677_v30 = vpop.f32.mrb[17].mxu1 }
 0x48b   :  { %v708_v31 = vmul.f32 2.0, %v677_v30  ;;  %v2519_v32 = vpop.f32.mrb[18].mxu1 }
 0x48c   :  { %v711_v33 = vmul.f32 2.0, %v2519_v32  ;;  %v680_v34 = vpop.f32.mrb[19].mxu1  ;;  %v718_v36 = vsub.f32 %v710_v29, %v3033_v49 }
 0x48d   :  { %v709_v35 = vmul.f32 2.0, %v680_v34  ;;  %v716_v38 = vsub.f32 %v708_v31, %v3023_v39 }
 0x48e   :  { %v719_v37 = vsub.f32 %v711_v33, %v3025_v40 }
 0x48f   :  { %v717_v41 = vsub.f32 %v709_v35, %v3027_v44 }
 0x490   :  { %v725_v42 = vpack.c.bf16 %v719_v37, %v718_v36 }
 0x491   :  { %v724_v43 = vpack.c.bf16 %v717_v41, %v716_v38  ;;  %v2522_v45 = vpop.f32.mrb[20].mxu1 }
 0x492   :  { %v714_v46 = vmul.f32 2.0, %v2522_v45  ;;  %v693_v47 = vpop.f32.mrb[21].mxu1 }
 0x493   :  { %v712_v48 = vmul.f32 2.0, %v693_v47  ;;  %v2523_v50 = vpop.f32.mrb[22].mxu1  ;;  %2552 = vmatprep.mubr.msk.bf16.mxu1 %vm740_vm12, %v724_v43 }
 0x494   :  { %v715_v51 = vmul.f32 2.0, %v2523_v50  ;;  %v696_v52 = vpop.f32.mrb[23].mxu1  ;;  %2553 = vmatmul.mubr.msk.bf16.vlgmr.msra.gmra.mrb[24].mxu1 %vm740_vm12, %v725_v42  ;;  %v722_v40 = vsub.f32 %v714_v46, %v3051_v0 }
 0x495   :  { %v713_v49 = vmul.f32 2.0, %v696_v52  ;;  %v720_v44 = vsub.f32 %v712_v48, %v3042_v60 }
 0x496   :  { %v723_v39 = vsub.f32 %v715_v51, %v3046_v62 }
 0x497   :  { %v721_v53 = vsub.f32 %v713_v49, %v3044_v61  ;;  %v1054_v61 = vsub.s32 5, %v3006_v2 }
 0x498   :  { %v727_v54 = vpack.c.bf16 %v723_v39, %v722_v40 }
 0x499   :  { %v726_v55 = vpack.c.bf16 %v721_v53, %v720_v44  ;;  %v1055_v16 = vrot.slane %v3012_v4, %v1054_v61 }
 0x49b   :  { %2556 = vmatprep.mubr.msk.bf16.mxu1 %vm740_vm12, %v726_v55 }
 0x49c   :  { %2557 = vmatmul.mubr.msk.bf16.gmra.mrb[28].mxu1 %vm740_vm12, %v727_v54 }
 0x49d   :  { %2636 = vmatprep.mubr.msk.bf16.mxu1 %vm78_vm0, %v2916_v8 }
 0x567   :  { %v2554_v59 = vpop.f32.mrb[24].mxu1 }
 0x568   :  { %v1010_v62 = vadd.f32 %v2554_v59, %v1007_v57  ;;  %v965_v60 = vpop.f32.mrb[25].mxu1 }
 0x569   :  { %v1008_v63 = vadd.f32 %v1007_v57, %v965_v60  ;;  %v2555_v0 = vpop.f32.mrb[26].mxu1 }
 0x56a   :  { %vm1018_vm13 = vcmp.gt.f32.partialorder %v1010_v62, 0.0  ;;  %v1026_v1 = vmul.f32 0.01, %v1010_v62  ;;  %v1011_v7 = vadd.f32 %v2555_v0, %v1007_v57  ;;  %v968_v9 = vpop.f32.mrb[27].mxu1 }
 0x56b   :  { %vm1016_vm14 = vcmp.gt.f32.partialorder %v1008_v63, 0.0  ;;  %v1024_v10 = vmul.f32 0.01, %v1008_v63  ;;  %v1009_v11 = vadd.f32 %v1007_v57, %v968_v9 }
 0x56c   :  { %vm1019_vm15 = vcmp.gt.f32.partialorder %v1011_v7, 0.0  ;;  %v1027_v12 = vmul.f32 0.01, %v1011_v7  ;;  %v1034_v17 = vsel %vm1018_vm13, %v1010_v62, %v1026_v1 }
 0x56d   :  { %v1032_v18 = vsel %vm1016_vm14, %v1008_v63, %v1024_v10  ;;  %vm1017_vm1 = vcmp.gt.f32.partialorder %v1009_v11, 0.0  ;;  %v1025_v19 = vmul.f32 0.01, %v1009_v11  ;;  %v1046_v25 = vmul.f32 %v1043_v5, %v1034_v17  ;;  %v2794_v17 = vld [vmem:[%s3403_s4 + $0x8] sm:$0xff]  }
 0x56e   :  { %v1044_v20 = vmul.f32 %v1043_v5, %v1032_v18  ;;  %v1035_v21 = vsel %vm1019_vm15, %v1011_v7, %v1027_v12  ;;  %v2792_v12 = vld [vmem:[%s3403_s4 + $0x18] sm:$0xff]   ;;  %v2795_v18 = vld [vmem:[%s3403_s4 + $0x20] sm:$0xff]  }
 0x56f   :  { %v1047_v22 = vmul.f32 %v1043_v5, %v1035_v21  ;;  %v1033_v23 = vsel %vm1017_vm1, %v1009_v11, %v1025_v19  ;;  %v2558_v24 = vpop.f32.mrb[28].mxu1  ;;  %v3127_v43 = vadd.f32 %v1055_v16, %v1046_v25  ;;  %v2791_v11 = vld [vmem:[%s3403_s4 + $0x10] sm:$0xff]   ;;  %v2796_v19 = vld [vmem:[%s3403_s4 + $0x28] sm:$0xff]  }
 0x570   :  { %v1045_v26 = vmul.f32 %v1043_v5, %v1033_v23  ;;  %v1014_v27 = vadd.f32 %v2558_v24, %v1007_v57  ;;  %v981_v28 = vpop.f32.mrb[29].mxu1  ;;  %v3117_v31 = vadd.f32 %v1055_v16, %v1044_v20 }
 0x571   :  { %v1012_v29 = vadd.f32 %v1007_v57, %v981_v28  ;;  %v2559_v30 = vpop.f32.mrb[30].mxu1  ;;  %v3119_v32 = vadd.f32 %v1055_v16, %v1047_v22 }
 0x572   :  { %vm1022_vm2 = vcmp.gt.f32.partialorder %v1014_v27, 0.0  ;;  %v1030_v33 = vmul.f32 0.01, %v1014_v27  ;;  %v1015_v34 = vadd.f32 %v2559_v30, %v1007_v57  ;;  %v984_v35 = vpop.f32.mrb[31].mxu1  ;;  %v3121_v36 = vadd.f32 %v1055_v16, %v1045_v26 }
 0x573   :  { %vm1020_vm3 = vcmp.gt.f32.partialorder %v1012_v29, 0.0  ;;  %v1028_v37 = vmul.f32 0.01, %v1012_v29  ;;  %v1013_v38 = vadd.f32 %v1007_v57, %v984_v35  ;;  %v3132_v51 = vpack.c.bf16 %v3119_v32, %v3127_v43 }
 0x574   :  { %vm1023_vm4 = vcmp.gt.f32.partialorder %v1015_v34, 0.0  ;;  %v1031_v41 = vmul.f32 0.01, %v1015_v34  ;;  %v3125_v42 = vpack.c.bf16 %v3121_v36, %v3117_v31  ;;  %v1038_v45 = vsel %vm1022_vm2, %v1014_v27, %v1030_v33 }
 0x575   :  { %v1036_v46 = vsel %vm1020_vm3, %v1012_v29, %v1028_v37  ;;  %vm1021_vm5 = vcmp.gt.f32.partialorder %v1013_v38, 0.0  ;;  %v1029_v47 = vmul.f32 0.01, %v1013_v38  ;;  %v1050_v40 = vmul.f32 %v1043_v5, %v1038_v45 }
 0x576   :  { %v1048_v48 = vmul.f32 %v1043_v5, %v1036_v46  ;;  %v1039_v50 = vsel %vm1023_vm4, %v1015_v34, %v1031_v41  ;;  %2560 = vmatprep.subr.bf16.mxu0 %v3125_v42 }
 0x577   :  { %v1051_v52 = vmul.f32 %v1043_v5, %v1039_v50  ;;  %v1037_v49 = vsel %vm1021_vm5, %v1013_v38, %v1029_v47  ;;  %2561 = vmatpush3.bf16.msra.mxu0 %v3125_v42  ;;  %v3145_v56 = vadd.f32 %v1055_v16, %v1050_v40  ;;  %v1531_v40 = vsub.s32 7, %v3006_v2 }
 0x578   :  { %v1049_v39 = vmul.f32 %v1043_v5, %v1037_v49  ;;  %2562 = vmatprep.subr.bf16.mxu0 %v3132_v51  ;;  %v3136_v44 = vadd.f32 %v1055_v16, %v1048_v48 }
 0x579   :  { %v3140_v54 = vadd.f32 %v1055_v16, %v1051_v52  ;;  %v1511_v52 = vsub.s32 6, %v3006_v2 }
 0x57a   :  { %v3138_v53 = vadd.f32 %v1055_v16, %v1049_v39  ;;  %v2793_v16 = vld [vmem:[%s3403_s4] sm:$0xff]   ;;  %v3211_v39 = vld [vmem:[%s3401_s7 + $0x8] sm:$0x3] }
 0x57b   :  { %2563 = vmatpush3.bf16.msra.mxu0 %v3132_v51  ;;  %v1079_v57 = vpack.c.bf16 %v3140_v54, %v3145_v56  ;;  %v1512_v49 = vrot.slane %v3012_v4, %v1511_v52  ;;  %v2797_v52 = vld [vmem:[%s3404_s5 + $0x10] sm:$0xff]  }
 0x57c   :  { %v1078_v55 = vpack.c.bf16 %v3138_v53, %v3136_v44 }
 0x57e   :  { %2564 = vmatprep.subr.bf16.mxu0 %v1078_v55 }
 0x57f   :  { %2565 = vmatpush3.bf16.msra.mxu0 %v1078_v55 }
 0x580   :  { %2566 = vmatprep.subr.bf16.mxu0 %v1079_v57 }
 0x583   :  { %2567 = vmatpush3.bf16.msra.mxu0 %v1079_v57 }
 0x586   :  { %2569 = vmatmul.mubr.msk.bf16.vlgmr.msra.gmra.mrb[16].mxu0 %vm78_vm0, %v2946_v13 }
 0x587   :  { %2572 = vmatprep.mubr.msk.bf16.mxu0 %vm78_vm0, %v2951_v14 }
 0x58e   :  { %2573 = vmatmul.mubr.msk.bf16.gmra.mrb[20].mxu0 %vm78_vm0, %v2960_v15 }
 0x58f   :  { %2584 = vmatprep.mubr.msk.bf16.mxu0 %vm78_vm0, %v2916_v8 }
 0x659   :  { %v2570_v58 = vpop.f32.mrb[16].mxu0 }
 0x65a   :  { %v1114_v59 = vpop.f32.mrb[17].mxu0 }
 0x65b   :  { %v2571_v62 = vpop.f32.mrb[18].mxu0 }
 0x65c   :  { %v1146_v60 = vpack.c.bf16 %v2571_v62, %v2570_v58  ;;  %v1117_v61 = vpop.f32.mrb[19].mxu0 }
 0x65d   :  { %v1145_v63 = vpack.c.bf16 %v1117_v61, %v1114_v59 }
 0x65f   :  { %2576 = vmatprep.subr.bf16.mxu0 %v1145_v63 }
 0x660   :  { %2577 = vmatpush3.bf16.msra.mxu0 %v1145_v63 }
 0x661   :  { %v2574_v0 = vpop.f32.mrb[20].mxu0  ;;  %2578 = vmatprep.subr.bf16.mxu0 %v1146_v60 }
 0x662   :  { %v1130_v1 = vpop.f32.mrb[21].mxu0 }
 0x663   :  { %v2575_v5 = vpop.f32.mrb[22].mxu0 }
 0x664   :  { %v1148_v7 = vpack.c.bf16 %v2575_v5, %v2574_v0  ;;  %v1133_v9 = vpop.f32.mrb[23].mxu0  ;;  %2579 = vmatpush3.bf16.msra.mxu0 %v1146_v60 }
 0x665   :  { %v1147_v10 = vpack.c.bf16 %v1133_v9, %v1130_v1 }
 0x667   :  { %2580 = vmatprep.subr.bf16.mxu0 %v1147_v10 }
 0x668   :  { %2581 = vmatpush3.bf16.msra.mxu0 %v1147_v10 }
 0x669   :  { %2582 = vmatprep.subr.bf16.mxu0 %v1148_v7 }
 0x66c   :  { %2583 = vmatpush3.bf16.msra.mxu0 %v1148_v7 }
 0x66d   :  { %2592 = vmatprep.subr.bf16.mxu0 %v2791_v11 }
 0x66f   :  { %2585 = vmatmul.mubr.msk.bf16.vlgmr.msra.gmra.mrb[24].mxu0 %vm78_vm0, %v2946_v13 }
 0x670   :  { %2588 = vmatprep.mubr.msk.bf16.mxu0 %vm78_vm0, %v2951_v14  ;;  %2593 = vmatpush3.bf16.msra.mxu0 %v2791_v11 }
 0x671   :  { %2594 = vmatprep.subr.bf16.mxu0 %v2792_v12 }
 0x674   :  { %2595 = vmatpush3.bf16.msra.mxu0 %v2792_v12 }
 0x675   :  { %2604 = vmatprep.subr.bf16.mxu0 %v2793_v16 }
 0x677   :  { %2589 = vmatmul.mubr.msk.bf16.gmra.mrb[28].mxu0 %vm78_vm0, %v2960_v15 }
 0x678   :  { %2596 = vmatprep.mubr.msk.bf16.mxu0 %vm740_vm12, %v1145_v63 }
 0x67f   :  { %2597 = vmatmul.mubr.msk.bf16.vlgmr.msra.gmra.mrb[32].mxu0 %vm740_vm12, %v1146_v60 }
 0x680   :  { %2600 = vmatprep.mubr.msk.bf16.mxu0 %vm740_vm12, %v1147_v10  ;;  %2605 = vmatpush3.bf16.msra.mxu0 %v2793_v16 }
 0x681   :  { %2606 = vmatprep.subr.bf16.mxu0 %v2794_v17 }
 0x684   :  { %2607 = vmatpush3.bf16.msra.mxu0 %v2794_v17 }
 0x685   :  { %2616 = vmatprep.subr.bf16.mxu0 %v2795_v18 }
 0x687   :  { %2601 = vmatmul.mubr.msk.bf16.gmra.mrb[36].mxu0 %vm740_vm12, %v1148_v7 }
 0x688   :  { %2608 = vmatprep.mubr.msk.bf16.mxu0 %vm740_vm12, %v3125_v42 }
 0x68f   :  { %2609 = vmatmul.mubr.msk.bf16.vlgmr.msra.gmra.mrb[32].mxu0 %vm740_vm12, %v3132_v51 }
 0x690   :  { %2612 = vmatprep.mubr.msk.bf16.mxu0 %vm740_vm12, %v1078_v55  ;;  %2617 = vmatpush3.bf16.msra.mxu0 %v2795_v18 }
 0x691   :  { %2618 = vmatprep.subr.bf16.mxu0 %v2796_v19 }
 0x694   :  { %2619 = vmatpush3.bf16.msra.mxu0 %v2796_v19 }
 0x697   :  { %2613 = vmatmul.mubr.msk.bf16.gmra.mrb[36].mxu0 %vm740_vm12, %v1079_v57 }
 0x742   :  { %v2586_v20 = vpop.f32.mrb[24].mxu0 }
 0x743   :  { %v1216_v21 = vmul.f32 2.0, %v2586_v20  ;;  %v1183_v22 = vpop.f32.mrb[25].mxu0 }
 0x744   :  { %v1214_v23 = vmul.f32 2.0, %v1183_v22  ;;  %v2587_v24 = vpop.f32.mrb[26].mxu0 }
 0x745   :  { %v1217_v25 = vmul.f32 2.0, %v2587_v24  ;;  %v1186_v26 = vpop.f32.mrb[27].mxu0  ;;  %v1224_v28 = vsub.f32 %v1216_v21, %v3127_v43 }
 0x746   :  { %v1215_v27 = vmul.f32 2.0, %v1186_v26  ;;  %v1222_v30 = vsub.f32 %v1214_v23, %v3117_v31 }
 0x747   :  { %v1225_v29 = vsub.f32 %v1217_v25, %v3119_v32 }
 0x748   :  { %v1223_v33 = vsub.f32 %v1215_v27, %v3121_v36 }
 0x749   :  { %v1231_v34 = vpack.c.bf16 %v1225_v29, %v1224_v28 }
 0x74a   :  { %v1230_v35 = vpack.c.bf16 %v1223_v33, %v1222_v30  ;;  %v2590_v37 = vpop.f32.mrb[28].mxu0 }
 0x74b   :  { %v1220_v38 = vmul.f32 2.0, %v2590_v37  ;;  %v1199_v41 = vpop.f32.mrb[29].mxu0 }
 0x74c   :  { %v1218_v42 = vmul.f32 2.0, %v1199_v41  ;;  %v2591_v45 = vpop.f32.mrb[30].mxu0  ;;  %2620 = vmatprep.mubr.msk.bf16.mxu0 %vm740_vm12, %v1230_v35 }
 0x74d   :  { %v1221_v46 = vmul.f32 2.0, %v2591_v45  ;;  %v1202_v47 = vpop.f32.mrb[31].mxu0  ;;  %2621 = vmatmul.mubr.msk.bf16.vlgmr.msra.gmra.mrb[32].mxu0 %vm740_vm12, %v1231_v34  ;;  %v1228_v32 = vsub.f32 %v1220_v38, %v3145_v56 }
 0x74e   :  { %v1219_v43 = vmul.f32 2.0, %v1202_v47  ;;  %v1226_v36 = vsub.f32 %v1218_v42, %v3136_v44 }
 0x74f   :  { %v1229_v31 = vsub.f32 %v1221_v46, %v3140_v54  ;;  %v1532_v54 = vrot.slane %v3012_v4, %v1531_v40  ;;  %v2821_v40 = vld [vmem:[%s3399_s0 + $0x8] sm:$0xff]  }
 0x750   :  { %v1227_v48 = vsub.f32 %v1219_v43, %v3138_v53 }
 0x751   :  { %v1233_v50 = vpack.c.bf16 %v1229_v31, %v1228_v32 }
 0x752   :  { %v1232_v51 = vpack.c.bf16 %v1227_v48, %v1226_v36 }
 0x754   :  { %2624 = vmatprep.mubr.msk.bf16.mxu0 %vm740_vm12, %v1232_v51 }
 0x755   :  { %2625 = vmatmul.mubr.msk.bf16.gmra.mrb[36].mxu0 %vm740_vm12, %v1233_v50 }
 0x756   :  { %2652 = vmatprep.mubr.msk.bf16.mxu0 %vm78_vm0, %v2916_v8  ;;  %v1544_v8 = vrot.slane %v3211_v39, %v500_v3 }
 0x820   :  { %v2622_v44 = vpop.f32.mrb[32].mxu0 }
 0x821   :  { %v1515_v53 = vadd.f32 %v2622_v44, %v1512_v49  ;;  %v1470_v55 = vpop.f32.mrb[33].mxu0  ;;  %v2822_v44 = vld [vmem:[%s3399_s0 + $0x18] sm:$0xff]  }
 0x822   :  { %v1513_v56 = vadd.f32 %v1512_v49, %v1470_v55  ;;  %v2623_v57 = vpop.f32.mrb[34].mxu0  ;;  %v2801_v55 = vld [vmem:[%s3404_s5 + $0x20] sm:$0xff]  }
 0x823   :  { %v1523_v58 = vmax.f32 %v1515_v53, 0.0  ;;  %v1516_v59 = vadd.f32 %v2623_v57, %v1512_v49  ;;  %v1473_v62 = vpop.f32.mrb[35].mxu0  ;;  %v2799_v53 = vld [vmem:[%s3404_s5] sm:$0xff]  }
 0x824   :  { %v1521_v60 = vmax.f32 %v1513_v56, 0.0  ;;  %v1514_v61 = vadd.f32 %v1512_v49, %v1473_v62  ;;  %v2802_v56 = vld [vmem:[%s3404_s5 + $0x28] sm:$0xff]  }
 0x825   :  { %v1535_v63 = vmul.f32 %v1532_v54, %v1523_v58  ;;  %v1524_v0 = vmax.f32 %v1516_v59, 0.0 }
 0x826   :  { %v1533_v1 = vmul.f32 %v1532_v54, %v1521_v60  ;;  %v1522_v5 = vmax.f32 %v1514_v61, 0.0 }
 0x827   :  { %v3217_v7 = vadd.f32 %v1544_v8, %v1535_v63  ;;  %v1536_v9 = vmul.f32 %v1532_v54, %v1524_v0 }
 0x828   :  { %v3219_v4 = vadd.f32 %v1544_v8, %v1533_v1  ;;  %v1534_v10 = vmul.f32 %v1532_v54, %v1522_v5  ;;  %v2626_v11 = vpop.f32.mrb[36].mxu0 }
 0x829   :  { %v3221_v12 = vadd.f32 %v1544_v8, %v1536_v9  ;;  %v1519_v16 = vadd.f32 %v2626_v11, %v1512_v49  ;;  %v1486_v3 = vpop.f32.mrb[37].mxu0 }
 0x82a   :  { %v3223_v17 = vadd.f32 %v1544_v8, %v1534_v10  ;;  %v1517_v18 = vadd.f32 %v1512_v49, %v1486_v3  ;;  %v2627_v19 = vpop.f32.mrb[38].mxu0 }
 0x82b   :  { %v1527_v20 = vmax.f32 %v1519_v16, 0.0  ;;  %v1520_v21 = vadd.f32 %v2627_v19, %v1512_v49  ;;  %v1489_v22 = vpop.f32.mrb[39].mxu0  ;;  %v3232_v30 = vpack.c.bf16 %v3221_v12, %v3217_v7 }
 0x82c   :  { %v1525_v23 = vmax.f32 %v1517_v18, 0.0  ;;  %v1518_v24 = vadd.f32 %v1512_v49, %v1489_v22  ;;  %v3227_v25 = vpack.c.bf16 %v3223_v17, %v3219_v4  ;;  %v2798_v49 = vld [vmem:[%s3404_s5 + $0x18] sm:$0xff]  }
 0x82d   :  { %v1539_v26 = vmul.f32 %v1532_v54, %v1527_v20  ;;  %v1528_v27 = vmax.f32 %v1520_v21, 0.0 }
 0x82e   :  { %v1537_v28 = vmul.f32 %v1532_v54, %v1525_v23  ;;  %v1526_v29 = vmax.f32 %v1518_v24, 0.0  ;;  %2628 = vmatprep.subr.bf16.mxu1 %v3227_v25 }
 0x82f   :  { %v3234_v33 = vadd.f32 %v1544_v8, %v1539_v26  ;;  %v1540_v34 = vmul.f32 %v1532_v54, %v1528_v27  ;;  %2629 = vmatpush3.bf16.msra.mxu1 %v3227_v25 }
 0x830   :  { %v3237_v35 = vadd.f32 %v1544_v8, %v1537_v28  ;;  %v1538_v37 = vmul.f32 %v1532_v54, %v1526_v29  ;;  %2630 = vmatprep.subr.bf16.mxu1 %v3232_v30  ;;  %v2800_v54 = vld [vmem:[%s3404_s5 + $0x8] sm:$0xff]  }
 0x831   :  { %v3240_v38 = vadd.f32 %v1544_v8, %v1540_v34 }
 0x832   :  { %v3242_v41 = vadd.f32 %v1544_v8, %v1538_v37 }
 0x833   :  { %2631 = vmatpush3.bf16.msra.mxu1 %v3232_v30  ;;  %v3252_v45 = vpack.c.bf16 %v3240_v38, %v3234_v33 }
 0x834   :  { %v3247_v42 = vpack.c.bf16 %v3242_v41, %v3237_v35 }
 0x836   :  { %2632 = vmatprep.subr.bf16.mxu1 %v3247_v42 }
 0x837   :  { %2633 = vmatpush3.bf16.msra.mxu1 %v3247_v42 }
 0x838   :  { %2634 = vmatprep.subr.bf16.mxu1 %v3252_v45 }
 0x83b   :  { %2635 = vmatpush3.bf16.msra.mxu1 %v3252_v45 }
 0x83e   :  { %2637 = vmatmul.mubr.msk.bf16.vlgmr.msra.gmra.mrb[32].mxu1 %vm78_vm0, %v2946_v13 }
 0x83f   :  { %2640 = vmatprep.mubr.msk.bf16.mxu1 %vm78_vm0, %v2951_v14 }
 0x846   :  { %2641 = vmatmul.mubr.msk.bf16.gmra.mrb[36].mxu1 %vm78_vm0, %v2960_v15 }
 0x847   :  { %2656 = vmatprep.mubr.msk.bf16.mxu1 %vm78_vm0, %v2951_v14 }
 0x911   :  { %v2638_v46 = vpop.f32.mrb[32].mxu1 }
 0x912   :  { %v1603_v47 = vpop.f32.mrb[33].mxu1 }
 0x913   :  { %v2639_v43 = vpop.f32.mrb[34].mxu1 }
 0x914   :  { %v1635_v32 = vpack.c.bf16 %v2639_v43, %v2638_v46  ;;  %v1606_v31 = vpop.f32.mrb[35].mxu1 }
 0x915   :  { %v1634_v36 = vpack.c.bf16 %v1606_v31, %v1603_v47 }
 0x917   :  { %2644 = vmatprep.subr.bf16.mxu0 %v1634_v36  ;;  %2708 = vmatprep.subr.bf16.mxu1 %v1634_v36 }
 0x918   :  { %2645 = vmatpush3.bf16.msra.mxu0 %v1634_v36  ;;  %2712 = vmatpush3.bf16.msra.mxu1 %v1634_v36 }
 0x919   :  { %v2642_v13 = vpop.f32.mrb[36].mxu1  ;;  %2646 = vmatprep.subr.bf16.mxu0 %v1635_v32  ;;  %2709 = vmatprep.subr.bf16.mxu1 %v1635_v32 }
 0x91a   :  { %v1619_v48 = vpop.f32.mrb[37].mxu1 }
 0x91b   :  { %v2643_v50 = vpop.f32.mrb[38].mxu1 }
 0x91c   :  { %v1637_v51 = vpack.c.bf16 %v2643_v50, %v2642_v13  ;;  %v1622_v15 = vpop.f32.mrb[39].mxu1  ;;  %2647 = vmatpush3.bf16.msra.mxu0 %v1635_v32  ;;  %2713 = vmatpush3.bf16.msra.mxu1 %v1635_v32 }
 0x91d   :  { %v1636_v14 = vpack.c.bf16 %v1622_v15, %v1619_v48 }
 0x91f   :  { %2648 = vmatprep.subr.bf16.mxu0 %v1636_v14  ;;  %2710 = vmatprep.subr.bf16.mxu1 %v1636_v14 }
 0x920   :  { %2649 = vmatpush3.bf16.msra.mxu0 %v1636_v14  ;;  %2714 = vmatpush3.bf16.msra.mxu1 %v1636_v14 }
 0x921   :  { %2650 = vmatprep.subr.bf16.mxu0 %v1637_v51  ;;  %2711 = vmatprep.subr.bf16.mxu1 %v1637_v51 }
 0x924   :  { %2651 = vmatpush3.bf16.msra.mxu0 %v1637_v51  ;;  %2715 = vmatpush3.bf16.msra.mxu1 %v1637_v51 }
 0x925   :  { %2660 = vmatprep.subr.bf16.mxu1 %v2797_v52 }
 0x927   :  { %2653 = vmatmul.mubr.msk.bf16.vlgmr.msra.gmra.mrb[40].mxu0 %vm78_vm0, %v2821_v40  ;;  %2657 = vmatmul.mubr.msk.bf16.vlgmr.msra.gmra.mrb[40].mxu1 %vm78_vm0, %v2822_v44 }
 0x928   :  { %2661 = vmatpush3.bf16.msra.mxu1 %v2797_v52  ;;  %2664 = vmatprep.mubr.msk.bf16.mxu1 %vm740_vm12, %v1634_v36 }
 0x929   :  { %2662 = vmatprep.subr.bf16.mxu1 %v2798_v49 }
 0x92c   :  { %2663 = vmatpush3.bf16.msra.mxu1 %v2798_v49 }
 0x92d   :  { %2672 = vmatprep.subr.bf16.mxu1 %v2799_v53 }
 0x92f   :  { %2665 = vmatmul.mubr.msk.bf16.vlgmr.msra.gmra.mrb[44].mxu1 %vm740_vm12, %v1635_v32 }
 0x930   :  { %2668 = vmatprep.mubr.msk.bf16.mxu1 %vm740_vm12, %v1636_v14  ;;  %2673 = vmatpush3.bf16.msra.mxu1 %v2799_v53 }
 0x931   :  { %2674 = vmatprep.subr.bf16.mxu1 %v2800_v54 }
 0x934   :  { %2675 = vmatpush3.bf16.msra.mxu1 %v2800_v54  ;;  %v2803_v54 = vld [vmem:[%s3405_s6] sm:$0xff]  }
 0x935   :  { %2684 = vmatprep.subr.bf16.mxu1 %v2801_v55  ;;  %2696 = vmatprep.subr.bf16.mxu0 %v2803_v54 }
 0x936   :  { %2697 = vmatpush3.bf16.msra.mxu0 %v2803_v54 }
 0x937   :  { %2669 = vmatmul.mubr.msk.bf16.gmra.mrb[48].mxu1 %vm740_vm12, %v1637_v51 }
 0x938   :  { %2676 = vmatprep.mubr.msk.bf16.mxu1 %vm740_vm12, %v3227_v25 }
 0x93f   :  { %2677 = vmatmul.mubr.msk.bf16.vlgmr.msra.gmra.mrb[44].mxu1 %vm740_vm12, %v3232_v30 }
 0x940   :  { %2680 = vmatprep.mubr.msk.bf16.mxu1 %vm740_vm12, %v3247_v42  ;;  %2685 = vmatpush3.bf16.msra.mxu1 %v2801_v55  ;;  %v2804_v55 = vld [vmem:[%s3405_s6 + $0x8] sm:$0xff]  }
 0x941   :  { %2686 = vmatprep.subr.bf16.mxu1 %v2802_v56  ;;  %2698 = vmatprep.subr.bf16.mxu0 %v2804_v55 }
 0x942   :  { %2699 = vmatpush3.bf16.msra.mxu0 %v2804_v55 }
 0x944   :  { %2687 = vmatpush3.bf16.msra.mxu1 %v2802_v56 }
 0x947   :  { %2681 = vmatmul.mubr.msk.bf16.gmra.mrb[48].mxu1 %vm740_vm12, %v3252_v45 }
 0x9fa   :  { %v2654_v57 = vpop.f32.mrb[40].mxu0  ;;  %v2658_v8 = vpop.f32.mrb[40].mxu1 }
 0x9fb   :  { %v1705_v58 = vmul.f32 2.0, %v2654_v57  ;;  %v1709_v59 = vmul.f32 2.0, %v2658_v8  ;;  %v1672_v62 = vpop.f32.mrb[41].mxu0  ;;  %v1688_v60 = vpop.f32.mrb[41].mxu1 }
 0x9fc   :  { %v1703_v61 = vmul.f32 2.0, %v1672_v62  ;;  %v1707_v63 = vmul.f32 2.0, %v1688_v60  ;;  %v2655_v0 = vpop.f32.mrb[42].mxu0  ;;  %v2659_v1 = vpop.f32.mrb[42].mxu1 }
 0x9fd   :  { %v1706_v5 = vmul.f32 2.0, %v2655_v0  ;;  %v1710_v9 = vmul.f32 2.0, %v2659_v1  ;;  %v1675_v10 = vpop.f32.mrb[43].mxu0  ;;  %v1691_v11 = vpop.f32.mrb[43].mxu1  ;;  %v1713_v18 = vsub.f32 %v1705_v58, %v3217_v7  ;;  %v1717_v19 = vsub.f32 %v1709_v59, %v3234_v33 }
 0x9fe   :  { %v1704_v16 = vmul.f32 2.0, %v1675_v10  ;;  %v1708_v3 = vmul.f32 2.0, %v1691_v11  ;;  %v1711_v22 = vsub.f32 %v1703_v61, %v3219_v4  ;;  %v1715_v23 = vsub.f32 %v1707_v63, %v3237_v35 }
 0x9ff   :  { %v1714_v20 = vsub.f32 %v1706_v5, %v3221_v12  ;;  %v1718_v21 = vsub.f32 %v1710_v9, %v3240_v38  ;;  %v2001_v7 = vrot.slane %v3211_v39, %v536_v6 }
 0xa00   :  { %v1712_v24 = vsub.f32 %v1704_v16, %v3223_v17  ;;  %v1716_v25 = vsub.f32 %v1708_v3, %v3242_v41 }
 0xa01   :  { %v1720_v26 = vpack.c.bf16 %v1714_v20, %v1713_v18  ;;  %v1722_v27 = vpack.c.bf16 %v1718_v21, %v1717_v19 }
 0xa02   :  { %v1719_v28 = vpack.c.bf16 %v1712_v24, %v1711_v22  ;;  %v1721_v29 = vpack.c.bf16 %v1716_v25, %v1715_v23 }
 0xa04   :  { %2688 = vmatprep.mubr.msk.bf16.mxu1 %vm740_vm12, %v1719_v28 }
 0xa05   :  { %2689 = vmatmul.mubr.msk.bf16.vlgmr.msra.gmra.mrb[44].mxu1 %vm740_vm12, %v1720_v26 }
 0xa06   :  { %2692 = vmatprep.mubr.msk.bf16.mxu1 %vm740_vm12, %v1721_v29 }
 0xa0d   :  { %2693 = vmatmul.mubr.msk.bf16.gmra.mrb[48].mxu1 %vm740_vm12, %v1722_v27 }
 0xad8   :  { %v2690_v4 = vpop.f32.mrb[44].mxu1 }
 0xad9   :  { %v3318_v12 = vadd.f32 %v2690_v4, %v2001_v7  ;;  %v1959_v17 = vpop.f32.mrb[45].mxu1 }
 0xada   :  { %v3320_v30 = vadd.f32 %v2001_v7, %v1959_v17  ;;  %v2691_v33 = vpop.f32.mrb[46].mxu1 }
 0xadb   :  { %v3322_v34 = vadd.f32 %v2691_v33, %v2001_v7  ;;  %v1962_v35 = vpop.f32.mrb[47].mxu1  ;;  %v2012_v37 = vmul.f32 %v3318_v12, %v3318_v12 }
 0xadc   :  { %v3326_v38 = vadd.f32 %v2001_v7, %v1962_v35  ;;  %v2010_v2 = vmul.f32 %v3320_v30, %v3320_v30  ;;  %v2284_v35 = vld [vmem:[%s3406_s8] ss:$0 sm:$0xff] }
 0xadd   :  { %v2024_v6 = vsel %vm740_vm12, %v2012_v37, 0.0  ;;  %v2013_v39 = vmul.f32 %v3322_v34, %v3322_v34 }
 0xade   :  { %2025 = vadd.xlane.f32.xlu1 %v2024_v6  ;;  %v2018_v41 = vsel %vm740_vm12, %v2010_v2, 0.0  ;;  %v2011_v42 = vmul.f32 %v3326_v38, %v3326_v38 }
 0xadf   :  { %2019 = vadd.xlane.f32.xlu0 %v2018_v41  ;;  %v2027_v47 = vsel %vm740_vm12, %v2013_v39, 0.0 }
 0xae0   :  { %v2694_v45 = vpop.f32.mrb[48].mxu1  ;;  %v2021_v36 = vsel %vm740_vm12, %v2011_v42, 0.0 }
 0xae1   :  { %v1975_v46 = vpop.f32.mrb[49].mxu1  ;;  %v3337_v43 = vadd.f32 %v2694_v45, %v2001_v7 }
 0xae2   :  { %v3339_v32 = vadd.f32 %v2001_v7, %v1975_v46  ;;  %2028 = vadd.xlane.f32.xlu1 %v2027_v47  ;;  %v2695_v31 = vpop.f32.mrb[50].mxu1 }
 0xae3   :  { %2022 = vadd.xlane.f32.xlu0 %v2021_v36  ;;  %v1978_v13 = vpop.f32.mrb[51].mxu1  ;;  %v3342_v48 = vadd.f32 %v2695_v31, %v2001_v7  ;;  %v2016_v52 = vmul.f32 %v3337_v43, %v3337_v43 }
 0xae4   :  { %v2007_v50 = vadd.f32 %v2001_v7, %v1978_v13  ;;  %v2014_v51 = vmul.f32 %v3339_v32, %v3339_v32 }
 0xae5   :  { %v2017_v40 = vmul.f32 %v3342_v48, %v3342_v48  ;;  %v2036_v44 = vsel %vm740_vm12, %v2016_v52, 0.0 }
 0xae6   :  { %v2030_v15 = vsel %vm740_vm12, %v2014_v51, 0.0  ;;  %v2015_v14 = vmul.f32 %v2007_v50, %v2007_v50 }
 0xae7   :  { %2031 = vadd.xlane.f32.xlu0 %v2030_v15  ;;  %v2039_v53 = vsel %vm740_vm12, %v2017_v40, 0.0 }
 0xae8   :  { %v2033_v49 = vsel %vm740_vm12, %v2015_v14, 0.0 }
 0xae9   :  { %2034 = vadd.xlane.f32.xlu1 %v2033_v49 }
 0xaeb   :  { %2037 = vadd.xlane.f32.xlu0 %v2036_v44 }
 0xaed   :  { %2040 = vadd.xlane.f32.xlu1 %v2039_v53 }
 0xb6b   :  { %v2026_v56 = vpop.xlane.xlu1 %2025 }
 0xb6c   :  { %v2044_v57 = vmax.f32 %v2026_v56, 1e-24  ;;  %v2020_v8 = vpop.xlane.xlu0 %2019 }
 0xb6d   :  { %v2042_v58 = vmax.f32 %v2020_v8, 1e-24 }
 0xb6e   :  { %2805 = vrsqrt.f32 %v2044_v57 }
 0xb6f   :  { %v2029_v59 = vpop.xlane.xlu1 %2028  ;;  %2807 = vrsqrt.f32 %v2042_v58 }
 0xb70   :  { %v2045_v62 = vmax.f32 %v2029_v59, 1e-24  ;;  %v2023_v60 = vpop.xlane.xlu0 %2022 }
 0xb71   :  { %v2043_v61 = vmax.f32 %v2023_v60, 1e-24 }
 0xb72   :  { %2809 = vrsqrt.f32 %v2045_v62 }
 0xb73   :  { %2811 = vrsqrt.f32 %v2043_v61 }
 0xb74   :  { %v2032_v63 = vpop.xlane.xlu0 %2031 }
 0xb75   :  { %v2046_v0 = vmax.f32 %v2032_v63, 1e-24 }
 0xb76   :  { %v2035_v1 = vpop.xlane.xlu1 %2034 }
 0xb77   :  { %2813 = vrsqrt.f32 %v2046_v0  ;;  %v2047_v5 = vmax.f32 %v2035_v1, 1e-24 }
 0xb78   :  { %v2038_v9 = vpop.xlane.xlu0 %2037  ;;  %v2806_v11 = vpop.eup %2805 }
 0xb79   :  { %2815 = vrsqrt.f32 %v2047_v5  ;;  %v2048_v10 = vmax.f32 %v2038_v9, 1e-24  ;;  %v2808_v3 = vpop.eup %2807  ;;  %v2060_v24 = vmul.f32 %v2806_v11, %v3318_v12 }
 0xb7a   :  { %v2041_v16 = vpop.xlane.xlu1 %2040  ;;  %v2058_v22 = vmul.f32 %v2808_v3, %v3320_v30 }
 0xb7b   :  { %2817 = vrsqrt.f32 %v2048_v10  ;;  %v2049_v18 = vmax.f32 %v2041_v16, 1e-24 }
 0xb7c   :  { %v2810_v19 = vpop.eup %2809 }
 0xb7d   :  { %v2812_v20 = vpop.eup %2811  ;;  %v2061_v21 = vmul.f32 %v2810_v19, %v3322_v34  ;;  %2819 = vrsqrt.f32 %v2049_v18 }
 0xb7e   :  { %v2059_v23 = vmul.f32 %v2812_v20, %v3326_v38 }
 0xb7f   :  { %v2067_v27 = vpack.c.bf16 %v2061_v21, %v2060_v24 }
 0xb80   :  { %v2066_v25 = vpack.c.bf16 %v2059_v23, %v2058_v22 }
 0xb81   :  { %v2814_v26 = vpop.eup %2813 }
 0xb82   :  { %2700 = vmatprep.mubr.msk.bf16.mxu0 %vm740_vm12, %v2066_v25  ;;  %v2062_v29 = vmul.f32 %v2814_v26, %v3339_v32 }
 0xb83   :  { %v2816_v28 = vpop.eup %2815  ;;  %2701 = vmatmul.mubr.msk.bf16.vlgmr.msra.gmra.mrb[44].mxu0 %vm740_vm12, %v2067_v27 }
 0xb84   :  { %v2063_v7 = vmul.f32 %v2816_v28, %v2007_v50 }
 0xb85   :  { %v2818_v4 = vpop.eup %2817 }
 0xb86   :  { %v2068_v17 = vpack.c.bf16 %v2063_v7, %v2062_v29  ;;  %v2064_v30 = vmul.f32 %v2818_v4, %v3337_v43 }
 0xb87   :  { %v2820_v33 = vpop.eup %2819 }
 0xb88   :  { %2704 = vmatprep.mubr.msk.bf16.mxu0 %vm740_vm12, %v2068_v17  ;;  %v2065_v12 = vmul.f32 %v2820_v33, %v3342_v48 }
 0xb8a   :  { %v2069_v34 = vpack.c.bf16 %v2065_v12, %v2064_v30 }
 0xb8c   :  { %2705 = vmatmul.mubr.msk.bf16.gmra.mrb[48].mxu0 %vm740_vm12, %v2069_v34 }
 0xc56   :  { %v2702_v37 = vpop.f32.mrb[44].mxu0 }
 0xc57   :  { %v2148_v38 = vadd.f32 %v2702_v37, %v2284_v35  ;;  %v2139_v2 = vpop.f32.mrb[45].mxu0 }
 0xc58   :  { %v2140_v6 = vadd.f32 %v2284_v35, %v2139_v2  ;;  %v2703_v39 = vpop.f32.mrb[46].mxu0 }
 0xc59   :  { %2172 = vst [vmem:[%s3407_s9 + $0x10] sm:$0xff] %v2148_v38  ;;  %v2151_v41 = vadd.f32 %v2703_v39, %v2284_v35  ;;  %v2142_v42 = vpop.f32.mrb[47].mxu0 }
 0xc5a   :  { %2170 = vst [vmem:[%s3407_s9] sm:$0xff] %v2140_v6  ;;  %v2143_v45 = vadd.f32 %v2284_v35, %v2142_v42 }
 0xc5b   :  { %2173 = vst [vmem:[%s3407_s9 + $0x18] sm:$0xff] %v2151_v41 }
 0xc5c   :  { %2171 = vst [vmem:[%s3407_s9 + $0x8] sm:$0xff] %v2143_v45 }
 0xc5f   :  { %v2706_v46 = vpop.f32.mrb[48].mxu0 }
 0xc60   :  { %v2164_v47 = vadd.f32 %v2706_v46, %v2284_v35  ;;  %v2155_v43 = vpop.f32.mrb[49].mxu0 }
 0xc61   :  { %v2156_v32 = vadd.f32 %v2284_v35, %v2155_v43  ;;  %v2707_v31 = vpop.f32.mrb[50].mxu0 }
 0xc62   :  { %2176 = vst [vmem:[%s3407_s9 + $0x30] sm:$0xff] %v2164_v47  ;;  %v2167_v36 = vadd.f32 %v2707_v31, %v2284_v35  ;;  %v2158_v13 = vpop.f32.mrb[51].mxu0 }
 0xc63   :  { %2174 = vst [vmem:[%s3407_s9 + $0x20] sm:$0xff] %v2156_v32  ;;  %v2159_v48 = vadd.f32 %v2284_v35, %v2158_v13 }
 0xc64   :  { %2177 = vst [vmem:[%s3407_s9 + $0x38] sm:$0xff] %v2167_v36 }
 0xc65   :  { %2175 = vst [vmem:[%s3407_s9 + $0x28] sm:$0xff] %v2159_v48 }

</bundles_post_ra>
